<compile_context>
chip_gen: v5e
topology: v5e:2x2
jax: 0.10.0
libtpu: 0.0.40
codegen_flags: <defaults>
</compile_context>

<pallas_src>
import jax
import jax.numpy as jnp
from jax import lax
from jax.experimental import pallas as pl
from jax.experimental.pallas import tpu as pltpu

IN_FEATURES = 784      # 1 * 28 * 28
OUT_FEATURES = 10
PADDED_OUT = 128       # lane-dense output / weight N dim
TM_MAX = 1024          # batch-tile cap (fits v7x's 64 MiB VMEM with headroom)
NEG_BIG = -1.0e30      # padded-lane bias: exp(pad - max) underflows to 0


def _round_up(a, m):
    return ((a + m - 1) // m) * m


def fc1_kernel(x_ref, w_ref, b_ref, o_ref):
    """x_ref: (TM, 784)  w_ref: (784, 128)  b_ref: (1, 128)  o_ref: (TM, 128)."""
    x = x_ref[...]
    w = w_ref[...]
    b = b_ref[...]

    # Linear: MXU-native (M,K)x(K,N). Full-f32 multi-pass (HIGHEST precision).
    logits = jnp.dot(
        x, w,
        preferred_element_type=jnp.float32,
        precision=lax.Precision.HIGHEST,
    ) + b

    # Numerically stable log_softmax along the lane axis. Padded lanes carry
    # bias = -1e30, so they never win the max and exp() of them is exactly 0.
    m = jnp.max(logits, axis=-1, keepdims=True)
    shifted = logits - m
    lse = jnp.log(jnp.sum(jnp.exp(shifted), axis=-1, keepdims=True))
    o_ref[...] = (shifted - lse).astype(o_ref.dtype)


def prepare_params(weight, bias):
    """One-time parameter prep (outside the jitted hot path).

    weight: (10, 784) PyTorch-native  ->  (784, 128) MXU-native, zero-padded.
    bias:   (10,)                     ->  (1, 128), padded lanes = -1e30.
    """
    w_t = jnp.asarray(weight, jnp.float32).T                       # (784, 10)
    w_padded = jnp.zeros((IN_FEATURES, PADDED_OUT), jnp.float32)
    w_padded = w_padded.at[:, :OUT_FEATURES].set(w_t)
    b_padded = jnp.full((1, PADDED_OUT), NEG_BIG, jnp.float32)
    b_padded = b_padded.at[0, :OUT_FEATURES].set(jnp.asarray(bias, jnp.float32))
    return w_padded, b_padded


@jax.jit
def fc1_forward(x, w_padded, b_padded):
    """x: [B, C, H, W] float32 (NCHW). Returns log-probabilities [B, 10]."""
    B = x.shape[0]
    x_flat = x.reshape(B, -1).astype(jnp.float32)      # nn.Flatten(), row-major
    assert x_flat.shape[1] == IN_FEATURES, x_flat.shape

    # Pad batch so block shapes satisfy the (8, 128) rule and divide the grid.
    b_pad = _round_up(B, 8)
    tm = min(b_pad, TM_MAX)
    b_pad = _round_up(b_pad, tm)
    if b_pad != B:
        x_flat = jnp.pad(x_flat, ((0, b_pad - B), (0, 0)))

    grid = (b_pad // tm,)

    out = pl.pallas_call(
        fc1_kernel,
        out_shape=jax.ShapeDtypeStruct((b_pad, PADDED_OUT), jnp.float32),
        grid_spec=pltpu.PrefetchScalarGridSpec(
            num_scalar_prefetch=0,
            grid=grid,
            in_specs=[
                # x: batch-tiled, streamed + double-buffered by the pipeline.
                pl.BlockSpec((tm, IN_FEATURES), lambda i: (i, 0)),
                # weight / bias: resident full-array across all grid steps.
                pl.BlockSpec((IN_FEATURES, PADDED_OUT), lambda i: (0, 0)),
                pl.BlockSpec((1, PADDED_OUT), lambda i: (0, 0)),
            ],
            out_specs=pl.BlockSpec((tm, PADDED_OUT), lambda i: (i, 0)),
        ),
        compiler_params=pltpu.CompilerParams(
            dimension_semantics=("parallel",),
        ),
        cost_estimate=pl.CostEstimate(
            flops=2 * b_pad * IN_FEATURES * OUT_FEATURES,
            transcendentals=b_pad * 2 * OUT_FEATURES,          # exp + log
            bytes_accessed=(b_pad * IN_FEATURES * 4
                            + IN_FEATURES * PADDED_OUT * 4
                            + b_pad * PADDED_OUT * 4),
        ),
    )(x_flat, w_padded, b_padded)

    # Drop batch padding and the padded logit lanes.
    return out[:B, :OUT_FEATURES]


def init_params(key):
    """Deterministic init mimicking torch.nn.Linear default (uniform +/- 1/sqrt(fan_in))."""
    kw, kb = jax.random.split(key)
    bound = 1.0 / jnp.sqrt(jnp.float32(IN_FEATURES))
    weight = jax.random.uniform(
        kw, (OUT_FEATURES, IN_FEATURES), jnp.float32, -bound, bound)
    bias = jax.random.uniform(
        kb, (OUT_FEATURES,), jnp.float32, -bound, bound)
    return weight, bias


def reference_forward(x, weight, bias):
    """Pure-JAX reference for sanity checking."""
    x_flat = x.reshape(x.shape[0], -1)
    logits = x_flat @ weight.T + bias
    return jax.nn.log_softmax(logits, axis=-1)


if __name__ == "__main__":
    key = jax.random.PRNGKey(0)
    k_x, k_p = jax.random.split(key)

    # Small batch, MNIST-like NCHW input: [2, 1, 28, 28] -> 784 features.
    x = jax.random.normal(k_x, (2, 1, 28, 28), jnp.float32)
    weight, bias = init_params(k_p)
    w_padded, b_padded = prepare_params(weight, bias)   # one-time prep

    out = fc1_forward(x, w_padded, b_padded)
    out = jax.block_until_ready(out)

    ref = reference_forward(x, weight, bias)
    assert out.shape == (2, 10), out.shape
    assert jnp.allclose(out, ref, atol=1e-5, rtol=1e-5), (
        "mismatch vs reference", jnp.max(jnp.abs(out - ref)))

    print("KERNEL_OK")
</pallas_src>

<mosaic_0001>
module attributes {stable_mosaic.version = 11 : i64} {
  func.func @fc1_kernel(%arg0: i32, %arg1: memref<8x784xf32, #tpu.memory_space<vmem>>, %arg2: memref<784x128xf32, #tpu.memory_space<vmem>>, %arg3: memref<1x128xf32, #tpu.memory_space<vmem>>, %arg4: memref<8x128xf32, #tpu.memory_space<vmem>>) attributes {dimension_semantics = [#tpu.dimension_semantics<parallel>], iteration_bounds = array<i64: 1>, scalar_prefetch = 0 : i64, scratch_operands = 0 : i64, tpu.core_type = #tpu.core_type<tc>, window_params = [{transform_indices = @transform_0, window_bounds = array<i64: 8, 784>}, {pipeline_mode = #tpu.pipeline_mode<synchronous>, transform_indices = @transform_1, window_bounds = array<i64: 784, 128>}, {pipeline_mode = #tpu.pipeline_mode<synchronous>, transform_indices = @transform_2, window_bounds = array<i64: 1, 128>}, {transform_indices = @transform_3, window_bounds = array<i64: 8, 128>}]} {
    %c0 = arith.constant 0 : index
    %c0_0 = arith.constant 0 : index
    %0 = vector.load %arg1[%c0, %c0_0] : memref<8x784xf32, #tpu.memory_space<vmem>>, vector<8x784xf32>
    %c0_1 = arith.constant 0 : index
    %c0_2 = arith.constant 0 : index
    %1 = vector.load %arg2[%c0_1, %c0_2] : memref<784x128xf32, #tpu.memory_space<vmem>>, vector<784x128xf32>
    %c0_3 = arith.constant 0 : index
    %c0_4 = arith.constant 0 : index
    %2 = vector.load %arg3[%c0_3, %c0_4] : memref<1x128xf32, #tpu.memory_space<vmem>>, vector<1x128xf32>
    %cst = arith.constant dense<0.000000e+00> : vector<8x128xf32>
    %3 = tpu.matmul %0, %1, %cst {dimension_numbers = #tpu.dot_dimension_numbers<[1], [0], [0], [1], [0, 0, 1, 1], [], []>, precision = #tpu.contract_precision<fp32>} : vector<8x784xf32>, vector<784x128xf32>, vector<8x128xf32> -> vector<8x128xf32>
    %4 = vector.broadcast %2 : vector<1x128xf32> to vector<8x128xf32>
    %5 = arith.addf %3, %4 : vector<8x128xf32>
    %cst_5 = arith.constant dense<0xFF800000> : vector<8xf32>
    %6 = vector.multi_reduction <maximumf>, %5, %cst_5 [1] : vector<8x128xf32> to vector<8xf32>
    %7 = vector.shape_cast %6 : vector<8xf32> to vector<8x1xf32>
    %8 = vector.broadcast %7 : vector<8x1xf32> to vector<8x128xf32>
    %9 = arith.subf %5, %8 : vector<8x128xf32>
    %10 = math.exp %9 : vector<8x128xf32>
    %cst_6 = arith.constant dense<0.000000e+00> : vector<8xf32>
    %11 = vector.multi_reduction <add>, %10, %cst_6 [1] : vector<8x128xf32> to vector<8xf32>
    %12 = vector.shape_cast %11 : vector<8xf32> to vector<8x1xf32>
    %13 = math.log %12 : vector<8x1xf32>
    %14 = vector.broadcast %13 : vector<8x1xf32> to vector<8x128xf32>
    %15 = arith.subf %9, %14 : vector<8x128xf32>
    %c0_7 = arith.constant 0 : index
    %c0_8 = arith.constant 0 : index
    %16 = vector.load %arg4[%c0_7, %c0_8] : memref<8x128xf32, #tpu.memory_space<vmem>>, vector<8x128xf32>
    tpu.vector_store %arg4[%c0_7, %c0_8], %15 {strides = array<i32>} : memref<8x128xf32, #tpu.memory_space<vmem>>, vector<8x128xf32>,
    return
  }
  func.func @transform_0(%arg0: i32) -> (i32, i32) {
    %c0_i32 = arith.constant 0 : i32
    %c0_i32_0 = arith.constant 0 : i32
    return %arg0, %c0_i32 : i32, i32
  }
  func.func @transform_1(%arg0: i32) -> (i32, i32) {
    %c0_i32 = arith.constant 0 : i32
    %c0_i32_0 = arith.constant 0 : i32
    %c0_i32_1 = arith.constant 0 : i32
    return %c0_i32, %c0_i32_0 : i32, i32
  }
  func.func @transform_2(%arg0: i32) -> (i32, i32) {
    %c0_i32 = arith.constant 0 : i32
    %c0_i32_0 = arith.constant 0 : i32
    %c0_i32_1 = arith.constant 0 : i32
    return %c0_i32, %c0_i32_0 : i32, i32
  }
  func.func @transform_3(%arg0: i32) -> (i32, i32) {
    %c0_i32 = arith.constant 0 : i32
    %c0_i32_0 = arith.constant 0 : i32
    return %arg0, %c0_i32 : i32, i32
  }
}

</mosaic_0001>

<bundles_post_ra>
// kernel: fc1_forward.1
= control target key start
LH: loop header
LB: loop body
LE: loop exit
PB: predicated region body
PF: predicated region fallthrough
CT: control target
= control target key end

     0   :  { %8 = vsyncpa [#allocation3], 0  ;;  %s2398_s15 = smov [#allocation2]   ;;  %s2399_s17 = smov 128   ;;  %s3977_s0 = inlined_call_operand.vmem [shape: f32[8,784], index: 0, kind: input, shape index: {}]   ;;  %s3978_s1 = inlined_call_operand.hbm [shape: f32[784,128], index: 1, kind: input, shape index: {}]   ;;  %s3979_s2 = inlined_call_operand.vmem [shape: f32[1,128], index: 2, kind: input, shape index: {}]   ;;  %s3980_s3 = inlined_call_operand.vmem [shape: f32[8,128], index: 3, kind: output, shape index: {}]  }
   0x1   :  { %s15_s14 = sshll.u32 %s3978_s1, 4  ;;  %s17_s16 = sshll.u32 %s2398_s15, 4  ;;  %s16_s14 = int_to_ptr.hbm [resolvable:$true] %s15_s14  ;;  %s18_s16 = int_to_ptr.vmem [resolvable:$true] %s17_s16 }
   0x2   :  { %s2400_s18 = smov 8  }
   0x3   :  { %23 = dma.hbm_to_vmem [thread:$0]  %s16_s14, 12544, %s18_s16, [#allocation3], %s2399_s17, %s2399_s17, %s2400_s18  }
   0x4   :  { %2396 = dma.done.wait [#allocation3], 12544  }
   0x5   :  { %2397 = vsyncadd [#allocation3], 4294954752  ;;  %v52_v0 = vld [vmem:[#allocation2 + $0x78] sm:$0xff]  ;;  %v51_v1 = vld [vmem:[#allocation2 + $0x70] sm:$0xff]  ;;  %vm139_vm0 = vcmask 130048  }
   0x6   :  { %v50_v2 = vld [vmem:[#allocation2 + $0x68] sm:$0xff]  ;;  %v2424_v3 = vand.u32 4294901760, %v52_v0  ;;  %v2426_v4 = vand.u32 4294901760, %v51_v1  ;;  %v49_v6 = vld [vmem:[#allocation2 + $0x60] sm:$0xff]  ;;  %v48_v7 = vld [vmem:[#allocation2 + $0x58] sm:$0xff] }
   0x7   :  { %v2428_v5 = vand.u32 4294901760, %v50_v2  ;;  %v47_v8 = vld [vmem:[#allocation2 + $0x50] sm:$0xff]  ;;  %v2430_v9 = vand.u32 4294901760, %v49_v6  ;;  %v2432_v10 = vand.u32 4294901760, %v48_v7  ;;  %v46_v12 = vld [vmem:[#allocation2 + $0x48] sm:$0xff]  ;;  %v45_v13 = vld [vmem:[#allocation2 + $0x40] sm:$0xff] }
   0x8   :  { %v2434_v11 = vand.u32 4294901760, %v47_v8  ;;  %144 = vmatpush.msra.mxu0 %v2424_v3  ;;  %v2438_v14 = vsub.f32 %v52_v0, %v2424_v3  ;;  %v2441_v15 = vsub.f32 %v51_v1, %v2426_v4  ;;  %340 = vmatpush.msra.mxu3 %v2424_v3  ;;  %v2447_v17 = vand.u32 4294901760, %v46_v12  ;;  %v44_v21 = vld [vmem:[#allocation2 + $0x38] sm:$0xff]  ;;  %v43_v26 = vld [vmem:[#allocation2 + $0x30] sm:$0xff]  ;;  %v42_v36 = vld [vmem:[#allocation2 + $0x28] sm:$0xff] }
   0x9   :  { %v2445_v16 = vsub.f32 %v50_v2, %v2428_v5  ;;  %v2450_v18 = vsub.f32 %v49_v6, %v2430_v9  ;;  %v2453_v19 = vsub.f32 %v48_v7, %v2432_v10  ;;  %v2463_v25 = vand.u32 4294901760, %v45_v13  ;;  %v41_v42 = vld [vmem:[#allocation2 + $0x20] sm:$0xff]  ;;  %v40_v47 = vld [vmem:[#allocation2 + $0x18] sm:$0xff]  ;;  %v39_v54 = vld [vmem:[#allocation2 + $0x10] sm:$0xff] }
   0xa   :  { %v2456_v20 = vsub.f32 %v47_v8, %v2434_v11  ;;  %146 = vmatpush.msra.mxu0 %v2426_v4  ;;  %287 = vmatpush.msra.mxu2 %v2438_v14  ;;  %v186_v22 = vand.u32 4294901760, %v2438_v14  ;;  %v3996_v23 = vand.u32 4294901760, %v2441_v15  ;;  %v2469_v29 = vsub.f32 %v46_v12, %v2447_v17  ;;  %v68_v59 = vld [vmem:[#allocation2 + $0xf8] sm:$0xff]  ;;  %v38_v61 = vld [vmem:[#allocation2 + $0x8] sm:$0xff]  ;;  %v37_v2 = vld [vmem:[#allocation2] sm:$0xff] }
   0xb   :  { %v3994_v24 = vand.u32 4294901760, %v2445_v16  ;;  %342 = vmatpush.msra.mxu3 %v2426_v4  ;;  %v3993_v27 = vand.u32 4294901760, %v2450_v18  ;;  %v3990_v28 = vand.u32 4294901760, %v2453_v19  ;;  %v2482_v33 = vand.u32 4294901760, %v44_v21  ;;  %v67_v6 = vld [vmem:[#allocation2 + $0xf0] sm:$0xff] }
   0xc   :  { %148 = vmatpush.msra.mxu0 %v2428_v5  ;;  %290 = vmatpush.msra.mxu2 %v2441_v15  ;;  %v187_v30 = vsub.f32 %v2438_v14, %v186_v22  ;;  %v193_v31 = vsub.f32 %v2441_v15, %v3996_v23  ;;  %v2485_v34 = vand.u32 4294901760, %v43_v26  ;;  %v3988_v35 = vand.u32 4294901760, %v2456_v20 }
   0xd   :  { %v199_v32 = vsub.f32 %v2445_v16, %v3994_v24  ;;  %344 = vmatpush.msra.mxu3 %v2428_v5  ;;  %v205_v39 = vsub.f32 %v2450_v18, %v3993_v27  ;;  %v2494_v40 = vsub.f32 %v45_v13, %v2463_v25  ;;  %v211_v41 = vsub.f32 %v2453_v19, %v3990_v28 }
   0xe   :  { %150 = vmatpush.msra.mxu0 %v2430_v9  ;;  %v188_v37 = vand.u32 4294901760, %v187_v30  ;;  %293 = vmatpush.msra.mxu2 %v2445_v16  ;;  %v194_v38 = vand.u32 4294901760, %v193_v31  ;;  %v2501_v44 = vand.u32 4294901760, %v42_v36  ;;  %v3987_v45 = vand.u32 4294901760, %v2469_v29 }
   0xf   :  { %346 = vmatpush.msra.mxu3 %v2430_v9  ;;  %v200_v43 = vand.u32 4294901760, %v199_v32  ;;  %v2505_v46 = vsub.f32 %v44_v21, %v2482_v33  ;;  %v217_v48 = vsub.f32 %v2456_v20, %v3988_v35  ;;  %v206_v49 = vand.u32 4294901760, %v205_v39  ;;  %v66_v32 = vld [vmem:[#allocation2 + $0xe8] sm:$0xff] }
  0x10   :  { %152 = vmatpush.msra.mxu0 %v2432_v10  ;;  %189 = vmatpush.msra.mxu1 %v188_v37  ;;  %v2513_v50 = vand.u32 4294901760, %v41_v42  ;;  %v3986_v51 = vand.u32 4294901760, %v2494_v40  ;;  %v2517_v52 = vsub.f32 %v43_v26, %v2485_v34  ;;  %v2521_v53 = vand.u32 4294901760, %v40_v47 }
  0x11   :  { %296 = vmatpush.msra.mxu2 %v2450_v18  ;;  %348 = vmatpush.msra.mxu3 %v2432_v10  ;;  %v212_v55 = vand.u32 4294901760, %v211_v41  ;;  %v223_v56 = vsub.f32 %v2469_v29, %v3987_v45  ;;  %v3985_v57 = vand.u32 4294901760, %v2505_v46  ;;  %v2529_v58 = vsub.f32 %v42_v36, %v2501_v44  ;;  %v61_v45 = vld [vmem:[#allocation2 + $0xc0] sm:$0xff] }
  0x12   :  { %154 = vmatpush.msra.mxu0 %v2434_v11  ;;  %195 = vmatpush.msra.mxu1 %v194_v38  ;;  %v218_v60 = vand.u32 4294901760, %v217_v48  ;;  %v229_v62 = vsub.f32 %v2494_v40, %v3986_v51  ;;  %v2537_v63 = vand.u32 4294901760, %v39_v54  ;;  %v3984_v0 = vand.u32 4294901760, %v2517_v52 }
  0x13   :  { %299 = vmatpush.msra.mxu2 %v2453_v19  ;;  %350 = vmatpush.msra.mxu3 %v2434_v11  ;;  %v2541_v1 = vsub.f32 %v41_v42, %v2513_v50  ;;  %v2546_v7 = vsub.f32 %v40_v47, %v2521_v53  ;;  %v2548_v8 = vand.u32 4294901760, %v68_v59  ;;  %v224_v12 = vand.u32 4294901760, %v223_v56 }
  0x14   :  { %156 = vmatpush.msra.mxu0 %v2447_v17  ;;  %201 = vmatpush.msra.mxu1 %v200_v43  ;;  %v235_v13 = vsub.f32 %v2505_v46, %v3985_v57  ;;  %v2554_v21 = vand.u32 4294901760, %v38_v61  ;;  %v3982_v26 = vand.u32 4294901760, %v2529_v58  ;;  %v2559_v30 = vand.u32 4294901760, %v37_v2  ;;  %v65_v43 = vld [vmem:[#allocation2 + $0xe0] sm:$0xff]  ;;  %v62_v57 = vld [vmem:[#allocation2 + $0xc8] sm:$0xff] }
  0x15   :  { %302 = vmatpush.msra.mxu2 %v2456_v20  ;;  %352 = vmatpush.msra.mxu3 %v2447_v17  ;;  %v2561_v31 = vand.u32 4294901760, %v67_v6  ;;  %v230_v36 = vand.u32 4294901760, %v229_v62  ;;  %v241_v37 = vsub.f32 %v2517_v52, %v3984_v0  ;;  %v3981_v38 = vand.u32 4294901760, %v2541_v1 }
  0x16   :  { %158 = vmatpush.msra.mxu0 %v2463_v25  ;;  %207 = vmatpush.msra.mxu1 %v206_v49  ;;  %4042 = vst [vmem:[#allocation5_spill] sm:$0xff] %v2559_v30  ;;  %v2569_v39 = vsub.f32 %v39_v54, %v2537_v63  ;;  %v3983_v41 = vand.u32 4294901760, %v2546_v7  ;;  %v2575_v42 = vsub.f32 %v68_v59, %v2548_v8  ;;  %v236_v47 = vand.u32 4294901760, %v235_v13  ;;  %v64_v59 = vld [vmem:[#allocation2 + $0xd8] sm:$0xff]  ;;  %v63_v13 = vld [vmem:[#allocation2 + $0xd0] sm:$0xff] }
  0x17   :  { %305 = vmatpush.msra.mxu2 %v2469_v29  ;;  %354 = vmatpush.msra.mxu3 %v2463_v25  ;;  %v247_v48 = vsub.f32 %v2529_v58, %v3982_v26  ;;  %v2582_v49 = vsub.f32 %v38_v61, %v2554_v21  ;;  %v2584_v54 = vand.u32 4294901760, %v66_v32  ;;  %v2592_v56 = vsub.f32 %v67_v6, %v2561_v31 }
  0x18   :  { %160 = vmatpush.msra.mxu0 %v2482_v33  ;;  %213 = vmatpush.msra.mxu1 %v212_v55  ;;  %v2589_v55 = vsub.f32 %v37_v2, %v2559_v30  ;;  %v253_v61 = vsub.f32 %v2541_v1, %v3981_v38  ;;  %v3989_v62 = vand.u32 4294901760, %v2569_v39  ;;  %v259_v2 = vsub.f32 %v2546_v7, %v3983_v41 }
  0x19   :  { %308 = vmatpush.msra.mxu2 %v2494_v40  ;;  %356 = vmatpush.msra.mxu3 %v2482_v33  ;;  %v3991_v6 = vand.u32 4294901760, %v2575_v42  ;;  %v2610_v38 = vsub.f32 %v66_v32, %v2584_v54  ;;  %v2612_v26 = vand.u32 4294901760, %v64_v59  ;;  %v3995_v0 = vand.u32 4294901760, %v2592_v56 }
  0x1a   :  { %162 = vmatpush.msra.mxu0 %v2485_v34  ;;  %219 = vmatpush.msra.mxu1 %v218_v60  ;;  %v242_v60 = vand.u32 4294901760, %v241_v37  ;;  %v3992_v37 = vand.u32 4294901760, %v2582_v49  ;;  %v3997_v41 = vand.u32 4294901760, %v2589_v55  ;;  %v265_v32 = vsub.f32 %v2569_v39, %v3989_v62 }
  0x1b   :  { %311 = vmatpush.msra.mxu2 %v2505_v46  ;;  %358 = vmatpush.msra.mxu3 %v2485_v34  ;;  %v2625_v51 = vand.u32 4294901760, %v63_v13  ;;  %v260_v35 = vand.u32 4294901760, %v259_v2  ;;  %v2638_v62 = vsub.f32 %v64_v59, %v2612_v26  ;;  %v2640_v28 = vand.u32 4294901760, %v62_v57  ;;  %v60_v2 = vld [vmem:[#allocation2 + $0xb8] sm:$0xff] }
  0x1c   :  { %164 = vmatpush.msra.mxu0 %v2501_v44  ;;  %225 = vmatpush.msra.mxu1 %v224_v12  ;;  %v2599_v12 = vand.u32 4294901760, %v65_v43  ;;  %v277_v59 = vsub.f32 %v2589_v55, %v3997_v41  ;;  %v2660_v23 = vand.u32 4294901760, %v60_v2  ;;  %v4044_v14 = vand.u32 4294901760, %v2441_v15 }
  0x1d   :  { %314 = vmatpush.msra.mxu2 %v2517_v52  ;;  %360 = vmatpush.msra.mxu3 %v2501_v44  ;;  %v2655_v24 = vsub.f32 %v63_v13, %v2625_v51  ;;  %v2668_v27 = vsub.f32 %v62_v57, %v2640_v28  ;;  %v4046_v15 = vand.u32 4294901760, %v2445_v16  ;;  %v4048_v16 = vand.u32 4294901760, %v2450_v18 }
  0x1e   :  { %166 = vmatpush.msra.mxu0 %v2513_v50  ;;  %231 = vmatpush.msra.mxu1 %v230_v36  ;;  %v248_v36 = vand.u32 4294901760, %v247_v48  ;;  %v2623_v48 = vsub.f32 %v65_v43, %v2599_v12  ;;  %v271_v43 = vsub.f32 %v2582_v49, %v3992_v37  ;;  %v266_v37 = vand.u32 4294901760, %v265_v32 }
  0x1f   :  { %317 = vmatpush.msra.mxu2 %v2529_v58  ;;  %362 = vmatpush.msra.mxu3 %v2513_v50  ;;  %v4043_v32 = vand.u32 4294901760, %v2610_v38  ;;  %v4050_v18 = vand.u32 4294901760, %v2453_v19 }
  0x20   :  { %168 = vmatpush.msra.mxu0 %v2521_v53  ;;  %237 = vmatpush.msra.mxu1 %v236_v47  ;;  %v254_v47 = vand.u32 4294901760, %v253_v61  ;;  %v59_v61 = vld [vmem:[#allocation2 + $0xb0] sm:$0xff] }
  0x21   :  { %320 = vmatpush.msra.mxu2 %v2541_v1  ;;  %364 = vmatpush.msra.mxu3 %v2521_v53  ;;  %v540_v41 = vsub.f32 %v2610_v38, %v4043_v32  ;;  %v4045_v32 = vand.u32 4294901760, %v2623_v48 }
  0x22   :  { %170 = vmatpush.msra.mxu0 %v2537_v63  ;;  %243 = vmatpush.msra.mxu1 %v242_v60  ;;  %v528_v60 = vsub.f32 %v2575_v42, %v3991_v6  ;;  %v2647_v6 = vand.u32 4294901760, %v61_v45 }
  0x23   :  { %323 = vmatpush.msra.mxu2 %v2546_v7  ;;  %366 = vmatpush.msra.mxu3 %v2537_v63  ;;  %v546_v13 = vsub.f32 %v2623_v48, %v4045_v32 }
  0x24   :  { %172 = vmatpush.msra.mxu0 %v2554_v21  ;;  %249 = vmatpush.msra.mxu1 %v248_v36  ;;  %v534_v36 = vsub.f32 %v2592_v56, %v3995_v0  ;;  %v529_v0 = vand.u32 4294901760, %v528_v60  ;;  %v58_v60 = vld [vmem:[#allocation2 + $0xa8] sm:$0xff] }
  0x25   :  { %326 = vmatpush.msra.mxu2 %v2569_v39  ;;  %368 = vmatpush.msra.mxu3 %v2554_v21  ;;  %v2693_v57 = vand.u32 4294901760, %v58_v60 }
  0x26   :  { %174 = vmatpush.msra.mxu0 %v2559_v30  ;;  %255 = vmatpush.msra.mxu1 %v254_v47  ;;  %v272_v47 = vand.u32 4294901760, %v271_v43  ;;  %v278_v43 = vand.u32 4294901760, %v277_v59  ;;  %v4047_v59 = vand.u32 4294901760, %v2638_v62 }
  0x27   :  { %329 = vmatpush.msra.mxu2 %v2582_v49  ;;  %370 = vmatpush.msra.mxu3 %v2559_v30  ;;  %v2681_v30 = vand.u32 4294901760, %v59_v61 }
  0x28   :  { %381 = vmatpush.msrb.mxu0 %v186_v22  ;;  %261 = vmatpush.msra.mxu1 %v260_v35  ;;  %v535_v22 = vand.u32 4294901760, %v534_v36  ;;  %v2674_v35 = vsub.f32 %v61_v45, %v2647_v6  ;;  %v2686_v45 = vsub.f32 %v60_v2, %v2660_v23  ;;  %v57_v36 = vld [vmem:[#allocation2 + $0xa0] sm:$0xff]  ;;  %v56_v2 = vld [vmem:[#allocation2 + $0x98] sm:$0xff] }
  0x29   :  { %332 = vmatpush.msra.mxu2 %v2589_v55  ;;  %530 = vmatpush.msrb.mxu3 %v529_v0  ;;  %v2705_v32 = vand.u32 4294901760, %v57_v36  ;;  %v2721_v19 = vand.u32 4294901760, %v56_v2 }
  0x2a   :  { %385 = vmatpush.msrb.mxu0 %v4044_v14  ;;  %267 = vmatpush.msra.mxu1 %v266_v37  ;;  %v541_v37 = vand.u32 4294901760, %v540_v41  ;;  %v552_v14 = vsub.f32 %v2638_v62, %v4047_v59  ;;  %v3999_v0 = vand.u32 4294901760, %v2674_v35  ;;  %v4049_v41 = vand.u32 4294901760, %v2655_v24 }
  0x2b   :  { %485 = vmatpush.msrb.mxu2 %v2548_v8  ;;  %536 = vmatpush.msrb.mxu3 %v535_v22  ;;  %v2703_v59 = vsub.f32 %v59_v61, %v2681_v30  ;;  %v4051_v61 = vand.u32 4294901760, %v2668_v27 }
  0x2c   :  { %389 = vmatpush.msrb.mxu0 %v4046_v15  ;;  %273 = vmatpush.msra.mxu1 %v272_v47  ;;  %v547_v47 = vand.u32 4294901760, %v546_v13  ;;  %v558_v15 = vsub.f32 %v2655_v24, %v4049_v41  ;;  %v30_v13 = vld [vmem:[%s3977_s0] sm:$0xff]  ;;  %v2719_v41 = vsub.f32 %v58_v60, %v2693_v57  ;;  %v2732_v60 = vsub.f32 %v57_v36, %v2705_v32 }
  0x2d   :  { %487 = vmatpush.msrb.mxu2 %v2561_v31  ;;  %542 = vmatpush.msrb.mxu3 %v541_v37  ;;  %v55_v37 = vld [vmem:[#allocation2 + $0x90] sm:$0xff]  ;;  %v2734_v22 = vand.u32 4294901760, %v30_v13 }
  0x2e   :  { %393 = vmatpush.msrb.mxu0 %v4048_v16  ;;  %279 = vmatpush.msra.mxu1 %v278_v43  ;;  %v553_v43 = vand.u32 4294901760, %v552_v14  ;;  %v564_v16 = vsub.f32 %v2668_v27, %v4051_v61  ;;  %v559_v14 = vand.u32 4294901760, %v558_v15  ;;  %v2744_v36 = vand.u32 4294901760, %v55_v37 }
  0x2f   :  { %489 = vmatpush.msrb.mxu2 %v2584_v54  ;;  %548 = vmatpush.msrb.mxu3 %v547_v47  ;;  %v2747_v61 = vsub.f32 %v56_v2, %v2721_v19  ;;  %v2758_v15 = vsub.f32 %v30_v13, %v2734_v22 }
  0x30   :  { %397 = vmatpush.msrb.mxu0 %v4050_v18  ;;  %448 = vmatpush.msrb.mxu1 %v2424_v3  ;;  %v4052_v3 = vand.u32 4294901760, %v2456_v20  ;;  %v570_v18 = vsub.f32 %v2674_v35, %v3999_v0  ;;  %v4053_v20 = vand.u32 4294901760, %v2469_v29  ;;  %v54_v0 = vld [vmem:[#allocation2 + $0x88] sm:$0xff]  ;;  %v565_v47 = vand.u32 4294901760, %v564_v16 }
  0x31   :  { %491 = vmatpush.msrb.mxu2 %v2599_v12  ;;  %554 = vmatpush.msrb.mxu3 %v553_v43  ;;  %v4055_v29 = vand.u32 4294901760, %v2494_v40  ;;  %v4056_v43 = vand.u32 4294901760, %v2703_v59  ;;  %v2760_v2 = vand.u32 4294901760, %v54_v0  ;;  %v4057_v40 = vand.u32 4294901760, %v2505_v46 }
  0x32   :  { %401 = vmatpush.msrb.mxu0 %v4052_v3  ;;  %450 = vmatpush.msrb.mxu1 %v2426_v4  ;;  %v4054_v4 = vand.u32 4294901760, %v2686_v45  ;;  %v2771_v13 = vsub.f32 %v55_v37, %v2744_v36  ;;  %v4059_v46 = vand.u32 4294901760, %v2517_v52 }
  0x33   :  { %493 = vmatpush.msrb.mxu2 %v2612_v26  ;;  %560 = vmatpush.msrb.mxu3 %v559_v14  ;;  %v582_v16 = vsub.f32 %v2703_v59, %v4056_v43  ;;  %v2784_v37 = vsub.f32 %v54_v0, %v2760_v2  ;;  %v4061_v0 = vand.u32 4294901760, %v2541_v1 }
  0x34   :  { %405 = vmatpush.msrb.mxu0 %v4053_v20  ;;  %452 = vmatpush.msrb.mxu1 %v2428_v5  ;;  %v576_v3 = vsub.f32 %v2686_v45, %v4054_v4  ;;  %v571_v5 = vand.u32 4294901760, %v570_v18  ;;  %v53_v20 = vld [vmem:[#allocation2 + $0x80] sm:$0xff]  ;;  %v593_v4 = vand.u32 4294901760, %v2732_v60  ;;  %v4058_v18 = vand.u32 4294901760, %v2719_v41 }
  0x35   :  { %495 = vmatpush.msrb.mxu2 %v2625_v51  ;;  %566 = vmatpush.msrb.mxu3 %v565_v47  ;;  %v2773_v43 = vand.u32 4294901760, %v53_v20  ;;  %v177_v47 = vand.u32 4294901760, %v2758_v15 }
  0x36   :  { %409 = vmatpush.msrb.mxu0 %v4055_v29  ;;  %454 = vmatpush.msrb.mxu1 %v2430_v9  ;;  %v577_v9 = vand.u32 4294901760, %v576_v3  ;;  %v588_v14 = vsub.f32 %v2719_v41, %v4058_v18  ;;  %v599_v29 = vand.u32 4294901760, %v2747_v61  ;;  %v594_v3 = vsub.f32 %v2732_v60, %v593_v4 }
  0x37   :  { %497 = vmatpush.msrb.mxu2 %v2640_v28  ;;  %572 = vmatpush.msrb.mxu3 %v571_v5  ;;  %v605_v5 = vand.u32 4294901760, %v2771_v13  ;;  %v611_v18 = vand.u32 4294901760, %v2784_v37 }
  0x38   :  { %413 = vmatpush.msrb.mxu0 %v4057_v40  ;;  %456 = vmatpush.msrb.mxu1 %v2432_v10  ;;  %v583_v10 = vand.u32 4294901760, %v582_v16  ;;  %v4060_v40 = vand.u32 4294901760, %v2529_v58  ;;  %v600_v52 = vsub.f32 %v2747_v61, %v599_v29  ;;  %v2795_v16 = vsub.f32 %v53_v20, %v2773_v43 }
  0x39   :  { %499 = vmatpush.msrb.mxu2 %v2647_v6  ;;  %578 = vmatpush.msrb.mxu3 %v577_v9  ;;  %v595_v58 = vand.u32 4294901760, %v594_v3  ;;  %v178_v9 = vsub.f32 %v2758_v15, %v177_v47  ;;  %v4062_v20 = vand.u32 4294901760, %v2546_v7  ;;  %v606_v1 = vsub.f32 %v2771_v13, %v605_v5 }
  0x3a   :  { %417 = vmatpush.msrb.mxu0 %v4059_v46  ;;  %458 = vmatpush.msrb.mxu1 %v2434_v11  ;;  %v589_v11 = vand.u32 4294901760, %v588_v14  ;;  %v617_v14 = vand.u32 4294901760, %v2795_v16  ;;  %v612_v7 = vsub.f32 %v2784_v37, %v611_v18  ;;  %v4064_v3 = vand.u32 4294901760, %v2582_v49 }
  0x3b   :  { %501 = vmatpush.msrb.mxu2 %v2660_v23  ;;  %584 = vmatpush.msrb.mxu3 %v583_v10  ;;  %v4063_v10 = vand.u32 4294901760, %v2569_v39  ;;  %v607_v39 = vand.u32 4294901760, %v606_v1 }
  0x3c   :  { %421 = vmatpush.msrb.mxu0 %v4060_v40  ;;  %460 = vmatpush.msrb.mxu1 %v2447_v17  ;;  %v31_v17 = vld [vmem:[%s3977_s0 + $0x8] sm:$0xff] }
  0x3d   :  { %503 = vmatpush.msrb.mxu2 %v2681_v30  ;;  %590 = vmatpush.msrb.mxu3 %v589_v11  ;;  %v2814_v46 = vand.u32 4294901760, %v31_v17  ;;  %v4065_v11 = vand.u32 4294901760, %v2589_v55  ;;  %v4068_v55 = vld [vmem:[#allocation5_spill] sm:$0xff] }
  0x3e   :  { %425 = vmatpush.msrb.mxu0 %v4061_v0  ;;  %462 = vmatpush.msrb.mxu1 %v2463_v25  ;;  %v601_v25 = vand.u32 4294901760, %v600_v52 }
  0x3f   :  { %505 = vmatpush.msrb.mxu2 %v2693_v57  ;;  %596 = vmatpush.msrb.mxu3 %v595_v58  ;;  %v2831_v40 = vsub.f32 %v31_v17, %v2814_v46 }
  0x40   :  { %429 = vmatpush.msrb.mxu0 %v4062_v20  ;;  %464 = vmatpush.msrb.mxu1 %v2482_v33  ;;  %v179_v33 = vand.u32 4294901760, %v178_v9  ;;  %v75_v9 = vld [vmem:[#allocation2 + $0x130] sm:$0xff] }
  0x41   :  { %507 = vmatpush.msrb.mxu2 %v2705_v32  ;;  %602 = vmatpush.msrb.mxu3 %v601_v25  ;;  %v518_v52 = vand.u32 4294901760, %v2831_v40 }
  0x42   :  { %433 = vmatpush.msrb.mxu0 %v4063_v10  ;;  %466 = vmatpush.msrb.mxu1 %v2485_v34  ;;  %v618_v34 = vsub.f32 %v2795_v16, %v617_v14 }
  0x43   :  { %509 = vmatpush.msrb.mxu2 %v2721_v19  ;;  %180 = vmatmul.f32.vlgmr.msra.gmra.mxu0 %v179_v33  ;;  %v2999_v33 = vand.u32 4294901760, %v75_v9 }
  0x44   :  { %437 = vmatpush.msrb.mxu0 %v4064_v3  ;;  %468 = vmatpush.msrb.mxu1 %v2501_v44  ;;  %v613_v44 = vand.u32 4294901760, %v612_v7  ;;  %v619_v49 = vand.u32 4294901760, %v618_v34  ;;  %v73_v3 = vld [vmem:[#allocation2 + $0x120] sm:$0xff] }
  0x45   :  { %511 = vmatpush.msrb.mxu2 %v2744_v36  ;;  %608 = vmatpush.msrb.mxu3 %v607_v39 }
  0x46   :  { %441 = vmatpush.msrb.mxu0 %v4065_v11  ;;  %470 = vmatpush.msrb.mxu1 %v2513_v50  ;;  %v4066_v50 = vand.u32 4294901760, %v2575_v42 }
  0x47   :  { %513 = vmatpush.msrb.mxu2 %v2760_v2  ;;  %614 = vmatpush.msrb.mxu3 %v613_v44 }
  0x48   :  { %628 = vmatpush.msra.mxu0 %v2575_v42  ;;  %472 = vmatpush.msrb.mxu1 %v2521_v53  ;;  %v519_v53 = vsub.f32 %v2831_v40, %v518_v52 }
  0x49   :  { %515 = vmatpush.msrb.mxu2 %v2773_v43  ;;  %620 = vmatpush.msrb.mxu3 %v619_v49 }
  0x4a   :  { %631 = vmatpush.msra.mxu0 %v2592_v56  ;;  %474 = vmatpush.msrb.mxu1 %v2537_v63  ;;  %v4067_v63 = vand.u32 4294901760, %v2592_v56  ;;  %v520_v42 = vand.u32 4294901760, %v519_v53  ;;  %v4070_v56 = vand.u32 4294901760, %v2623_v48  ;;  %v3026_v53 = vand.u32 4294901760, %v73_v3 }
  0x4b   :  { %335 = vmatmul.f32.vlgmr.msra.gmra.mxu2 %v2758_v15  ;;  %374 = vmatmul.f32.vlgmr.msra.gmra.mxu3 %v177_v47  ;;  %v78_v15 = vld [vmem:[#allocation2 + $0x148] sm:$0xff] }
  0x4c   :  { %634 = vmatpush.msra.mxu0 %v2610_v38  ;;  %722 = vmatpush.msra.mxu2 %v4066_v50  ;;  %v2962_v47 = vand.u32 4294901760, %v78_v15 }
  0x4d   :  { %476 = vmatpush.msrb.mxu1 %v2554_v21  ;;  %789 = vmatpush.msra.mxu3 %v2548_v8  ;;  %v4069_v21 = vand.u32 4294901760, %v2610_v38  ;;  %v4071_v38 = vand.u32 4294901760, %v2638_v62 }
  0x4e   :  { %637 = vmatpush.msra.mxu0 %v2623_v48  ;;  %726 = vmatpush.msra.mxu2 %v4067_v63  ;;  %v2989_v1 = vsub.f32 %v78_v15, %v2962_v47 }
  0x4f   :  { %478 = vmatpush.msrb.mxu1 %v4068_v55  ;;  %791 = vmatpush.msra.mxu3 %v2561_v31  ;;  %v3030_v55 = vsub.f32 %v75_v9, %v2999_v33 }
  0x50   :  { %640 = vmatpush.msra.mxu0 %v2638_v62  ;;  %281 = vmatmul.f32.vlgmr.msra.gmra.mxu1 %v2734_v22  ;;  %v4006_v11 = vand.u32 4294901760, %v2989_v1 }
  0x51   :  { %730 = vmatpush.msra.mxu2 %v4069_v21  ;;  %681 = vmatpush.msra.mxu1 %v2548_v8  ;;  %v4072_v8 = vand.u32 4294901760, %v2655_v24 }
  0x52   :  { %643 = vmatpush.msra.mxu0 %v2655_v24  ;;  %793 = vmatpush.msra.mxu3 %v2584_v54  ;;  %v4074_v24 = vand.u32 4294901760, %v2674_v35 }
  0x53   :  { %734 = vmatpush.msra.mxu2 %v4070_v56  ;;  %683 = vmatpush.msra.mxu1 %v2561_v31  ;;  %v4073_v31 = vand.u32 4294901760, %v2668_v27 }
  0x54   :  { %521 = vmatmul.f32.vlgmr.msrb.gmra.mxu2 %v520_v42  ;;  %646 = vmatpush.msra.mxu0 %v2668_v27  ;;  %v83_v27 = vld [vmem:[#allocation2 + $0x170] sm:$0xff] }
  0x55   :  { %685 = vmatpush.msra.mxu1 %v2584_v54  ;;  %738 = vmatpush.msra.mxu2 %v4071_v38  ;;  %v84_v54 = vld [vmem:[#allocation2 + $0x178] sm:$0xff]  ;;  %v2907_v48 = vand.u32 4294901760, %v83_v27  ;;  %v71_v42 = vld [vmem:[#allocation2 + $0x110] sm:$0xff]  ;;  %v905_v38 = vsub.f32 %v2989_v1, %v4006_v11 }
  0x56   :  { %795 = vmatpush.msra.mxu3 %v2599_v12  ;;  %443 = vmatmul.f32.vlgmr.msrb.gmra.mxu0 %v2734_v22  ;;  %v2900_v62 = vand.u32 4294901760, %v84_v54 }
  0x57   :  { %622 = vmatmul.f32.vlgmr.msrb.gmra.mxu3 %v2814_v46  ;;  %649 = vmatpush.msra.mxu0 %v2674_v35 }
  0x58   :  { %687 = vmatpush.msra.mxu1 %v2599_v12  ;;  %742 = vmatpush.msra.mxu2 %v4072_v8  ;;  %v4077_v12 = vand.u32 4294901760, %v2719_v41 }
  0x59   :  { %797 = vmatpush.msra.mxu3 %v2612_v26  ;;  %480 = vmatmul.f32.vlgmr.msrb.gmra.mxu1 %v2734_v22  ;;  %v79_v22 = vld [vmem:[#allocation2 + $0x150] sm:$0xff] }
  0x5a   :  { %652 = vmatpush.msra.mxu0 %v2686_v45  ;;  %689 = vmatpush.msra.mxu1 %v2612_v26  ;;  %v4075_v26 = vand.u32 4294901760, %v2686_v45  ;;  %v80_v45 = vld [vmem:[#allocation2 + $0x158] sm:$0xff] }
  0x5b   :  { %746 = vmatpush.msra.mxu2 %v4073_v31  ;;  %799 = vmatpush.msra.mxu3 %v2625_v51 }
  0x5c   :  { %655 = vmatpush.msra.mxu0 %v2703_v59  ;;  %691 = vmatpush.msra.mxu1 %v2625_v51  ;;  %v4076_v51 = vand.u32 4294901760, %v2703_v59  ;;  %v2927_v59 = vsub.f32 %v83_v27, %v2907_v48  ;;  %v3052_v27 = vand.u32 4294901760, %v71_v42 }
  0x5d   :  { %750 = vmatpush.msra.mxu2 %v4074_v24  ;;  %801 = vmatpush.msra.mxu3 %v2640_v28 }
  0x5e   :  { %658 = vmatpush.msra.mxu0 %v2719_v41  ;;  %693 = vmatpush.msra.mxu1 %v2640_v28  ;;  %v82_v28 = vld [vmem:[#allocation2 + $0x168] sm:$0xff]  ;;  %v2931_v41 = vand.u32 4294901760, %v80_v45 }
  0x5f   :  { %754 = vmatpush.msra.mxu2 %v4075_v26  ;;  %803 = vmatpush.msra.mxu3 %v2647_v6  ;;  %v2914_v35 = vand.u32 4294901760, %v82_v28 }
  0x60   :  { %661 = vmatpush.msra.mxu0 %v2732_v60  ;;  %695 = vmatpush.msra.mxu1 %v2647_v6  ;;  %v81_v6 = vld [vmem:[#allocation2 + $0x160] sm:$0xff]  ;;  %v2942_v60 = vand.u32 4294901760, %v79_v22 }
  0x61   :  { %758 = vmatpush.msra.mxu2 %v4076_v51  ;;  %805 = vmatpush.msra.mxu3 %v2660_v23  ;;  %v4003_v51 = vand.u32 4294901760, %v3030_v55 }
  0x62   :  { %664 = vmatpush.msra.mxu0 %v2747_v61  ;;  %697 = vmatpush.msra.mxu1 %v2660_v23  ;;  %v2917_v23 = vsub.f32 %v84_v54, %v2900_v62  ;;  %v2938_v61 = vsub.f32 %v82_v28, %v2914_v35  ;;  %v3056_v28 = vsub.f32 %v73_v3, %v3026_v53 }
  0x63   :  { %762 = vmatpush.msra.mxu2 %v4077_v12  ;;  %807 = vmatpush.msra.mxu3 %v2681_v30  ;;  %v70_v12 = vld [vmem:[#allocation2 + $0x108] sm:$0xff] }
  0x64   :  { %667 = vmatpush.msra.mxu0 %v2771_v13  ;;  %699 = vmatpush.msra.mxu1 %v2681_v30  ;;  %v2924_v30 = vand.u32 4294901760, %v81_v6 }
  0x65   :  { %766 = vmatpush.msra.mxu2 %v593_v4  ;;  %809 = vmatpush.msra.mxu3 %v2693_v57 }
  0x66   :  { %670 = vmatpush.msra.mxu0 %v2784_v37  ;;  %701 = vmatpush.msra.mxu1 %v2693_v57  ;;  %v868_v57 = vand.u32 4294901760, %v2917_v23  ;;  %v2949_v4 = vsub.f32 %v81_v6, %v2924_v30  ;;  %v880_v37 = vand.u32 4294901760, %v2938_v61 }
  0x67   :  { %770 = vmatpush.msra.mxu2 %v599_v29  ;;  %811 = vmatpush.msra.mxu3 %v2705_v32  ;;  %v2954_v29 = vsub.f32 %v80_v45, %v2931_v41  ;;  %v906_v45 = vand.u32 4294901760, %v905_v38 }
  0x68   :  { %673 = vmatpush.msra.mxu0 %v2795_v16  ;;  %703 = vmatpush.msra.mxu1 %v2705_v32  ;;  %v874_v32 = vand.u32 4294901760, %v2927_v59  ;;  %v869_v13 = vsub.f32 %v2917_v23, %v868_v57  ;;  %v4012_v17 = vand.u32 4294901760, %v2949_v4  ;;  %v881_v20 = vsub.f32 %v2938_v61, %v880_v37 }
  0x69   :  { %774 = vmatpush.msra.mxu2 %v605_v5  ;;  %813 = vmatpush.msra.mxu3 %v2721_v19  ;;  %v76_v5 = vld [vmem:[#allocation2 + $0x138] sm:$0xff]  ;;  %v4009_v58 = vand.u32 4294901760, %v2954_v29 }
  0x6a   :  { %676 = vmatmul.f32.vlgmr.msra.gmra.mxu0 %v2831_v40  ;;  %705 = vmatpush.msra.mxu1 %v2721_v19  ;;  %v77_v19 = vld [vmem:[#allocation2 + $0x140] sm:$0xff]  ;;  %v875_v16 = vsub.f32 %v2927_v59, %v874_v32  ;;  %v2986_v25 = vand.u32 4294901760, %v76_v5  ;;  %v887_v10 = vsub.f32 %v2949_v4, %v4012_v17  ;;  %v882_v39 = vand.u32 4294901760, %v881_v20  ;;  %v32_v40 = vld [vmem:[%s3977_s0 + $0x10] sm:$0xff]  ;;  %v92_v17 = vld [vmem:[#allocation2 + $0x1b8] sm:$0xff] }
  0x6b   :  { %826 = vmatpush.msrb.mxu0 %v2900_v62  ;;  %778 = vmatpush.msra.mxu2 %v611_v18  ;;  %v2975_v0 = vand.u32 4294901760, %v77_v19  ;;  %v870_v18 = vand.u32 4294901760, %v869_v13  ;;  %v3034_v56 = vand.u32 4294901760, %v32_v40  ;;  %v100_v13 = vld [vmem:[#allocation2 + $0x1f8] sm:$0xff]  ;;  %v4000_v20 = vand.u32 4294901760, %v3056_v28 }
  0x6c   :  { %815 = vmatpush.msra.mxu3 %v2744_v36  ;;  %707 = vmatpush.msra.mxu1 %v2744_v36  ;;  %v2968_v36 = vsub.f32 %v79_v22, %v2942_v60  ;;  %v3015_v44 = vsub.f32 %v76_v5, %v2986_v25  ;;  %v888_v50 = vand.u32 4294901760, %v887_v10  ;;  %v3073_v5 = vand.u32 4294901760, %v70_v12 }
  0x6d   :  { %828 = vmatpush.msrb.mxu0 %v2907_v48  ;;  %782 = vmatpush.msra.mxu2 %v617_v14  ;;  %v74_v14 = vld [vmem:[#allocation2 + $0x128] sm:$0xff]  ;;  %v3002_v7 = vsub.f32 %v77_v19, %v2975_v0  ;;  %v3061_v6 = vsub.f32 %v32_v40, %v3034_v56  ;;  %v3086_v10 = vand.u32 4294901760, %v100_v13 }
  0x6e   :  { %817 = vmatpush.msra.mxu3 %v2760_v2  ;;  %784 = vmatmul.f32.vlgmr.msra.gmra.mxu2 %v2814_v46  ;;  %v3011_v34 = vand.u32 4294901760, %v74_v14  ;;  %v4004_v31 = vand.u32 4294901760, %v3015_v44 }
  0x6f   :  { %830 = vmatpush.msrb.mxu0 %v2914_v35  ;;  %969 = vmatpush.msrb.mxu2 %v2917_v23  ;;  %v4005_v63 = vand.u32 4294901760, %v3002_v7 }
  0x70   :  { %709 = vmatpush.msra.mxu1 %v2760_v2  ;;  %819 = vmatpush.msra.mxu3 %v2773_v43  ;;  %v4008_v2 = vand.u32 4294901760, %v2968_v36  ;;  %v3044_v24 = vsub.f32 %v74_v14, %v3011_v34  ;;  %v917_v22 = vsub.f32 %v3015_v44, %v4004_v31  ;;  %v3081_v14 = vsub.f32 %v71_v42, %v3052_v27 }
  0x71   :  { %821 = vmatmul.f32.vlgmr.msra.gmra.mxu3 %v2814_v46  ;;  %832 = vmatpush.msrb.mxu0 %v2924_v30  ;;  %v876_v46 = vand.u32 4294901760, %v875_v16  ;;  %v911_v26 = vsub.f32 %v3002_v7, %v4005_v63  ;;  %v69_v16 = vld [vmem:[#allocation2 + $0x100] sm:$0xff]  ;;  %v935_v42 = vsub.f32 %v3056_v28, %v4000_v20 }
  0x72   :  { %972 = vmatpush.msrb.mxu2 %v2927_v59  ;;  %1022 = vmatpush.msrb.mxu3 %v2900_v62  ;;  %v899_v49 = vsub.f32 %v2968_v36, %v4008_v2  ;;  %v4001_v15 = vand.u32 4294901760, %v3044_v24  ;;  %v918_v3 = vand.u32 4294901760, %v917_v22  ;;  %v3092_v40 = vand.u32 4294901760, %v69_v16 }
  0x73   :  { %711 = vmatpush.msra.mxu1 %v2773_v43  ;;  %834 = vmatpush.msrb.mxu0 %v2931_v41  ;;  %v893_v43 = vsub.f32 %v2954_v29, %v4009_v58  ;;  %v912_v9 = vand.u32 4294901760, %v911_v26  ;;  %v4007_v38 = vand.u32 4294901760, %v3081_v14  ;;  %v97_v26 = vld [vmem:[#allocation2 + $0x1e0] sm:$0xff] }
  0x74   :  { %715 = vmatmul.f32.vlgmr.msra.gmra.mxu1 %v518_v52  ;;  %975 = vmatpush.msrb.mxu2 %v2938_v61  ;;  %v72_v52 = vld [vmem:[#allocation2 + $0x118] sm:$0xff]  ;;  %v900_v54 = vand.u32 4294901760, %v899_v49 }
  0x75   :  { %871 = vmatpush.msrb.mxu1 %v870_v18  ;;  %1024 = vmatpush.msrb.mxu3 %v2907_v48  ;;  %v894_v21 = vand.u32 4294901760, %v893_v43  ;;  %v3040_v8 = vand.u32 4294901760, %v72_v52  ;;  %v923_v18 = vsub.f32 %v3030_v55, %v4003_v51  ;;  %v99_v43 = vld [vmem:[#allocation2 + $0x1f0] sm:$0xff] }
  0x76   :  { %836 = vmatpush.msrb.mxu0 %v2942_v60  ;;  %978 = vmatpush.msrb.mxu2 %v2949_v4 }
  0x77   :  { %877 = vmatpush.msrb.mxu1 %v876_v46  ;;  %1026 = vmatpush.msrb.mxu3 %v2914_v35  ;;  %v3069_v19 = vsub.f32 %v72_v52, %v3040_v8  ;;  %v4014_v46 = vand.u32 4294901760, %v3061_v6  ;;  %v3098_v52 = vsub.f32 %v70_v12, %v3073_v5 }
  0x78   :  { %838 = vmatpush.msrb.mxu0 %v2962_v47  ;;  %981 = vmatpush.msrb.mxu2 %v2954_v29 }
  0x79   :  { %883 = vmatpush.msrb.mxu1 %v882_v39  ;;  %1028 = vmatpush.msrb.mxu3 %v2924_v30  ;;  %v929_v39 = vsub.f32 %v3044_v24, %v4001_v15  ;;  %v4002_v49 = vand.u32 4294901760, %v3069_v19  ;;  %v860_v12 = vsub.f32 %v3061_v6, %v4014_v46  ;;  %v96_v15 = vld [vmem:[#allocation2 + $0x1d8] sm:$0xff]  ;;  %v91_v46 = vld [vmem:[#allocation2 + $0x1b0] sm:$0xff] }
  0x7a   :  { %840 = vmatpush.msrb.mxu0 %v2975_v0  ;;  %984 = vmatpush.msrb.mxu2 %v2968_v36  ;;  %v3139_v63 = vand.u32 4294901760, %v96_v15 }
  0x7b   :  { %889 = vmatpush.msrb.mxu1 %v888_v50  ;;  %1030 = vmatpush.msrb.mxu3 %v2931_v41  ;;  %v98_v50 = vld [vmem:[#allocation2 + $0x1e8] sm:$0xff]  ;;  %v930_v22 = vand.u32 4294901760, %v929_v39  ;;  %v936_v39 = vand.u32 4294901760, %v935_v42  ;;  %v861_v51 = vand.u32 4294901760, %v860_v12 }
  0x7c   :  { %842 = vmatpush.msrb.mxu0 %v2986_v25  ;;  %987 = vmatpush.msrb.mxu2 %v2989_v1  ;;  %v3122_v20 = vand.u32 4294901760, %v98_v50 }
  0x7d   :  { %895 = vmatpush.msrb.mxu1 %v894_v21  ;;  %1032 = vmatpush.msrb.mxu3 %v2942_v60  ;;  %v924_v21 = vand.u32 4294901760, %v923_v18  ;;  %v3120_v18 = vsub.f32 %v69_v16, %v3092_v40  ;;  %v947_v16 = vsub.f32 %v3081_v14, %v4007_v38 }
  0x7e   :  { %844 = vmatpush.msrb.mxu0 %v2999_v33  ;;  %990 = vmatpush.msrb.mxu2 %v3002_v7  ;;  %v3144_v38 = vsub.f32 %v98_v50, %v3122_v20 }
  0x7f   :  { %901 = vmatpush.msrb.mxu1 %v900_v54  ;;  %1034 = vmatpush.msrb.mxu3 %v2962_v47  ;;  %v3105_v54 = vand.u32 4294901760, %v99_v43  ;;  %v4013_v11 = vand.u32 4294901760, %v3120_v18 }
  0x80   :  { %846 = vmatpush.msrb.mxu0 %v3011_v34  ;;  %993 = vmatpush.msrb.mxu2 %v3015_v44 }
  0x81   :  { %907 = vmatpush.msrb.mxu1 %v906_v45  ;;  %1036 = vmatpush.msrb.mxu3 %v2975_v0  ;;  %v3113_v45 = vsub.f32 %v100_v13, %v3086_v10  ;;  %v4010_v13 = vand.u32 4294901760, %v3098_v52 }
  0x82   :  { %848 = vmatpush.msrb.mxu0 %v3026_v53  ;;  %996 = vmatpush.msrb.mxu2 %v3030_v55 }
  0x83   :  { %913 = vmatpush.msrb.mxu1 %v912_v9  ;;  %1038 = vmatpush.msrb.mxu3 %v2986_v25  ;;  %v941_v9 = vsub.f32 %v3069_v19, %v4002_v49  ;;  %v3134_v49 = vsub.f32 %v99_v43, %v3105_v54  ;;  %v4011_v31 = vand.u32 4294901760, %v3113_v45  ;;  %v953_v43 = vsub.f32 %v3098_v52, %v4010_v13 }
  0x84   :  { %850 = vmatpush.msrb.mxu0 %v3040_v8  ;;  %999 = vmatpush.msrb.mxu2 %v3044_v24  ;;  %v3163_v13 = vsub.f32 %v96_v15, %v3139_v63 }
  0x85   :  { %919 = vmatpush.msrb.mxu1 %v918_v3  ;;  %1040 = vmatpush.msrb.mxu3 %v2999_v33  ;;  %v3127_v3 = vand.u32 4294901760, %v97_v26  ;;  %v942_v42 = vand.u32 4294901760, %v941_v9  ;;  %v948_v9 = vand.u32 4294901760, %v947_v16  ;;  %v4016_v2 = vand.u32 4294901760, %v3134_v49 }
  0x86   :  { %852 = vmatpush.msrb.mxu0 %v3052_v27  ;;  %1002 = vmatpush.msrb.mxu2 %v3056_v28  ;;  %v1210_v58 = vsub.f32 %v3113_v45, %v4011_v31  ;;  %v954_v31 = vand.u32 4294901760, %v953_v43 }
  0x87   :  { %925 = vmatpush.msrb.mxu1 %v924_v21  ;;  %1042 = vmatpush.msrb.mxu3 %v3011_v34  ;;  %v95_v21 = vld [vmem:[#allocation2 + $0x1d0] sm:$0xff]  ;;  %v3152_v12 = vsub.f32 %v97_v26, %v3127_v3  ;;  %v93_v26 = vld [vmem:[#allocation2 + $0x1c0] sm:$0xff]  ;;  %v1216_v23 = vsub.f32 %v3134_v49, %v4016_v2 }
  0x88   :  { %854 = vmatpush.msrb.mxu0 %v3073_v5  ;;  %1005 = vmatpush.msrb.mxu2 %v3069_v19  ;;  %v3156_v50 = vand.u32 4294901760, %v95_v21  ;;  %v1211_v43 = vand.u32 4294901760, %v1210_v58  ;;  %v4078_v58 = vand.u32 4294901760, %v3061_v6 }
  0x89   :  { %931 = vmatpush.msrb.mxu1 %v930_v22  ;;  %1044 = vmatpush.msrb.mxu3 %v3026_v53  ;;  %v94_v22 = vld [vmem:[#allocation2 + $0x1c8] sm:$0xff]  ;;  %v4017_v15 = vand.u32 4294901760, %v3152_v12 }
  0x8a   :  { %856 = vmatpush.msrb.mxu0 %v3092_v40  ;;  %1008 = vmatpush.msrb.mxu2 %v3081_v14  ;;  %v3171_v16 = vand.u32 4294901760, %v94_v22 }
  0x8b   :  { %937 = vmatpush.msrb.mxu1 %v936_v39  ;;  %1046 = vmatpush.msrb.mxu3 %v3040_v8  ;;  %v959_v39 = vsub.f32 %v3120_v18, %v4013_v11  ;;  %v4018_v11 = vand.u32 4294901760, %v3163_v13  ;;  %v1228_v61 = vsub.f32 %v3152_v12, %v4017_v15 }
  0x8c   :  { %862 = vmatmul.f32.vlgmr.msrb.gmra.mxu0 %v861_v51  ;;  %1011 = vmatpush.msrb.mxu2 %v3098_v52  ;;  %v4015_v51 = vand.u32 4294901760, %v3144_v38 }
  0x8d   :  { %1063 = vmatpush.msra.mxu0 %v868_v57  ;;  %943 = vmatpush.msrb.mxu1 %v942_v42  ;;  %v3182_v57 = vsub.f32 %v95_v21, %v3156_v50  ;;  %v3184_v42 = vand.u32 4294901760, %v93_v26  ;;  %v960_v59 = vand.u32 4294901760, %v959_v39  ;;  %v3196_v21 = vsub.f32 %v94_v22, %v3171_v16  ;;  %v88_v22 = vld [vmem:[#allocation2 + $0x198] sm:$0xff] }
  0x8e   :  { %1048 = vmatpush.msrb.mxu3 %v3052_v27  ;;  %1014 = vmatpush.msrb.mxu2 %v3120_v18  ;;  %v4079_v39 = vand.u32 4294901760, %v2949_v4  ;;  %v1234_v15 = vsub.f32 %v3163_v13, %v4018_v11  ;;  %v4080_v4 = vand.u32 4294901760, %v2954_v29  ;;  %v4082_v11 = vand.u32 4294901760, %v2968_v36 }
  0x8f   :  { %1067 = vmatpush.msra.mxu0 %v874_v32  ;;  %949 = vmatpush.msrb.mxu1 %v948_v9  ;;  %v1222_v32 = vsub.f32 %v3144_v38, %v4015_v51  ;;  %v3198_v9 = vand.u32 4294901760, %v92_v17  ;;  %v1217_v51 = vand.u32 4294901760, %v1216_v23  ;;  %v3210_v2 = vsub.f32 %v93_v26, %v3184_v42 }
  0x90   :  { %1050 = vmatpush.msrb.mxu3 %v3073_v5  ;;  %1017 = vmatmul.f32.vlgmr.msrb.gmra.mxu2 %v3061_v6  ;;  %v89_v6 = vld [vmem:[#allocation2 + $0x1a0] sm:$0xff]  ;;  %v4081_v29 = vand.u32 4294901760, %v3182_v57  ;;  %v4083_v36 = vand.u32 4294901760, %v2989_v1  ;;  %v33_v1 = vld [vmem:[%s3977_s0 + $0x18] sm:$0xff] }
  0x91   :  { %1071 = vmatpush.msra.mxu0 %v880_v37  ;;  %1167 = vmatpush.msra.mxu2 %v3086_v10  ;;  %v90_v37 = vld [vmem:[#allocation2 + $0x1a8] sm:$0xff]  ;;  %v1223_v23 = vand.u32 4294901760, %v1222_v32  ;;  %v3222_v26 = vsub.f32 %v92_v17, %v3198_v9  ;;  %v87_v32 = vld [vmem:[#allocation2 + $0x190] sm:$0xff] }
  0x92   :  { %955 = vmatpush.msrb.mxu1 %v954_v31  ;;  %1052 = vmatpush.msrb.mxu3 %v3092_v40  ;;  %v3212_v31 = vand.u32 4294901760, %v91_v46 }
  0x93   :  { %1056 = vmatmul.f32.vlgmr.msrb.gmra.mxu3 %v4078_v58  ;;  %1075 = vmatpush.msra.mxu0 %v4079_v39  ;;  %v4019_v58 = vand.u32 4294901760, %v3196_v21  ;;  %v3224_v39 = vand.u32 4294901760, %v90_v37 }
  0x94   :  { %1169 = vmatpush.msra.mxu2 %v3105_v54  ;;  %1212 = vmatpush.msra.mxu3 %v1211_v43  ;;  %v1229_v43 = vand.u32 4294901760, %v1228_v61  ;;  %v3234_v17 = vsub.f32 %v91_v46, %v3212_v31  ;;  %v1235_v61 = vand.u32 4294901760, %v1234_v15 }
  0x95   :  { %961 = vmatpush.msrb.mxu1 %v960_v59  ;;  %1079 = vmatpush.msra.mxu0 %v4080_v4  ;;  %v1240_v59 = vsub.f32 %v3182_v57, %v4081_v29  ;;  %v3236_v4 = vand.u32 4294901760, %v89_v6  ;;  %v3247_v46 = vsub.f32 %v90_v37, %v3224_v39  ;;  %v3249_v29 = vand.u32 4294901760, %v88_v22 }
  0x96   :  { %963 = vmatmul.f32.vlgmr.msrb.gmra.mxu1 %v3034_v56  ;;  %1171 = vmatpush.msra.mxu2 %v3122_v20 }
  0x97   :  { %1130 = vmatpush.msra.mxu1 %v2900_v62  ;;  %1218 = vmatpush.msra.mxu3 %v1217_v51  ;;  %v1246_v62 = vsub.f32 %v3196_v21, %v4019_v58  ;;  %v4020_v51 = vand.u32 4294901760, %v3222_v26  ;;  %v3260_v37 = vsub.f32 %v89_v6, %v3236_v4  ;;  %v86_v58 = vld [vmem:[#allocation2 + $0x188] sm:$0xff] }
  0x98   :  { %1083 = vmatpush.msra.mxu0 %v4082_v11  ;;  %1173 = vmatpush.msra.mxu2 %v3127_v3  ;;  %v4084_v11 = vand.u32 4294901760, %v3210_v2 }
  0x99   :  { %1132 = vmatpush.msra.mxu1 %v2907_v48  ;;  %1224 = vmatpush.msra.mxu3 %v1223_v23  ;;  %v1241_v48 = vand.u32 4294901760, %v1240_v59  ;;  %v1258_v6 = vsub.f32 %v3222_v26, %v4020_v51  ;;  %v85_v23 = vld [vmem:[#allocation2 + $0x180] sm:$0xff]  ;;  %v4088_v59 = vand.u32 4294901760, %v3030_v55  ;;  %v4090_v55 = vand.u32 4294901760, %v3044_v24 }
  0x9a   :  { %1087 = vmatpush.msra.mxu0 %v4083_v36  ;;  %1175 = vmatpush.msra.mxu2 %v3139_v63  ;;  %v1252_v15 = vsub.f32 %v3210_v2, %v4084_v11  ;;  %v4085_v36 = vand.u32 4294901760, %v3002_v7  ;;  %v3276_v11 = vsub.f32 %v88_v22, %v3249_v29  ;;  %v4086_v7 = vand.u32 4294901760, %v3015_v44 }
  0x9b   :  { %1134 = vmatpush.msra.mxu1 %v2914_v35  ;;  %1230 = vmatpush.msra.mxu3 %v1229_v43  ;;  %v3268_v35 = vand.u32 4294901760, %v87_v32  ;;  %v1247_v43 = vand.u32 4294901760, %v1246_v62  ;;  %v4087_v62 = vand.u32 4294901760, %v3234_v17  ;;  %v1275_v22 = vand.u32 4294901760, %v3260_v37 }
  0x9c   :  { %1091 = vmatpush.msra.mxu0 %v4085_v36  ;;  %1177 = vmatpush.msra.mxu2 %v3156_v50  ;;  %v3281_v36 = vand.u32 4294901760, %v86_v58 }
  0x9d   :  { %1136 = vmatpush.msra.mxu1 %v2924_v30  ;;  %1236 = vmatpush.msra.mxu3 %v1235_v61  ;;  %v3283_v30 = vand.u32 4294901760, %v33_v1  ;;  %v1253_v61 = vand.u32 4294901760, %v1252_v15  ;;  %v1264_v51 = vsub.f32 %v3234_v17, %v4087_v62  ;;  %v3294_v44 = vsub.f32 %v87_v32, %v3268_v35 }
  0x9e   :  { %1095 = vmatpush.msra.mxu0 %v4086_v7  ;;  %1179 = vmatpush.msra.mxu2 %v3171_v16  ;;  %v3296_v7 = vand.u32 4294901760, %v85_v23  ;;  %v1281_v62 = vand.u32 4294901760, %v3276_v11  ;;  %v3307_v32 = vsub.f32 %v86_v58, %v3281_v36 }
  0x9f   :  { %1138 = vmatpush.msra.mxu1 %v2931_v41  ;;  %1242 = vmatpush.msra.mxu3 %v1241_v48  ;;  %v1259_v41 = vand.u32 4294901760, %v1258_v6  ;;  %v4089_v48 = vand.u32 4294901760, %v3247_v46  ;;  %v4091_v6 = vand.u32 4294901760, %v3056_v28  ;;  %v1287_v24 = vand.u32 4294901760, %v3294_v44 }
  0xa0   :  { %1099 = vmatpush.msra.mxu0 %v4088_v59  ;;  %1181 = vmatpush.msra.mxu2 %v3184_v42  ;;  %v3310_v59 = vsub.f32 %v33_v1, %v3283_v30  ;;  %v3321_v58 = vsub.f32 %v85_v23, %v3296_v7  ;;  %v4092_v1 = vand.u32 4294901760, %v3069_v19  ;;  %v1293_v28 = vand.u32 4294901760, %v3307_v32 }
  0xa1   :  { %1140 = vmatpush.msra.mxu1 %v2942_v60  ;;  %1248 = vmatpush.msra.mxu3 %v1247_v43  ;;  %v1270_v15 = vsub.f32 %v3247_v46, %v4089_v48  ;;  %v1265_v60 = vand.u32 4294901760, %v1264_v51  ;;  %v1276_v43 = vsub.f32 %v3260_v37, %v1275_v22  ;;  %v1282_v51 = vsub.f32 %v3276_v11, %v1281_v62 }
  0xa2   :  { %1103 = vmatpush.msra.mxu0 %v4090_v55  ;;  %1183 = vmatpush.msra.mxu2 %v3198_v9  ;;  %v1288_v19 = vsub.f32 %v3294_v44, %v1287_v24 }
  0xa3   :  { %1142 = vmatpush.msra.mxu1 %v2962_v47  ;;  %1254 = vmatpush.msra.mxu3 %v1253_v61  ;;  %v1271_v47 = vand.u32 4294901760, %v1270_v15  ;;  %v1200_v61 = vand.u32 4294901760, %v3310_v59  ;;  %v1277_v23 = vand.u32 4294901760, %v1276_v43  ;;  %v1283_v48 = vand.u32 4294901760, %v1282_v51  ;;  %v108_v43 = vld [vmem:[#allocation2 + $0x238] sm:$0xff] }
  0xa4   :  { %1107 = vmatpush.msra.mxu0 %v4091_v6  ;;  %1185 = vmatpush.msra.mxu2 %v3212_v31  ;;  %v4094_v15 = vand.u32 4294901760, %v3098_v52  ;;  %v1289_v52 = vand.u32 4294901760, %v1288_v19 }
  0xa5   :  { %1144 = vmatpush.msra.mxu1 %v2975_v0  ;;  %1260 = vmatpush.msra.mxu3 %v1259_v41  ;;  %v4093_v0 = vand.u32 4294901760, %v3081_v14  ;;  %v1299_v41 = vand.u32 4294901760, %v3321_v58  ;;  %v1201_v14 = vsub.f32 %v3310_v59, %v1200_v61 }
  0xa6   :  { %1111 = vmatpush.msra.mxu0 %v4092_v1  ;;  %1187 = vmatpush.msra.mxu2 %v3224_v39 }
  0xa7   :  { %1146 = vmatpush.msra.mxu1 %v2986_v25  ;;  %1266 = vmatpush.msra.mxu3 %v1265_v60  ;;  %v1294_v25 = vsub.f32 %v3307_v32, %v1293_v28  ;;  %v1300_v55 = vsub.f32 %v3321_v58, %v1299_v41 }
  0xa8   :  { %1115 = vmatpush.msra.mxu0 %v4093_v0  ;;  %1189 = vmatpush.msra.mxu2 %v3236_v4  ;;  %v106_v0 = vld [vmem:[#allocation2 + $0x228] sm:$0xff] }
  0xa9   :  { %1148 = vmatpush.msra.mxu1 %v2999_v33  ;;  %1272 = vmatpush.msra.mxu3 %v1271_v47  ;;  %v4095_v33 = vand.u32 4294901760, %v3120_v18  ;;  %v1295_v60 = vand.u32 4294901760, %v1294_v25  ;;  %v1301_v18 = vand.u32 4294901760, %v1300_v55  ;;  %v107_v47 = vld [vmem:[#allocation2 + $0x230] sm:$0xff]  ;;  %v104_v55 = vld [vmem:[#allocation2 + $0x218] sm:$0xff] }
  0xaa   :  { %1119 = vmatpush.msra.mxu0 %v4094_v15  ;;  %1191 = vmatpush.msra.mxu2 %v3249_v29  ;;  %v105_v15 = vld [vmem:[#allocation2 + $0x220] sm:$0xff] }
  0xab   :  { %1150 = vmatpush.msra.mxu1 %v3011_v34  ;;  %1278 = vmatpush.msra.mxu3 %v1277_v23  ;;  %v1202_v34 = vand.u32 4294901760, %v1201_v14  ;;  %v3527_v14 = vand.u32 4294901760, %v106_v0 }
  0xac   :  { %1123 = vmatpush.msra.mxu0 %v4095_v33  ;;  %1193 = vmatpush.msra.mxu2 %v3268_v35 }
  0xad   :  { %1152 = vmatpush.msra.mxu1 %v3026_v53  ;;  %1284 = vmatpush.msra.mxu3 %v1283_v48  ;;  %v4096_v53 = vand.u32 4294901760, %v3113_v45 }
  0xae   :  { %1125 = vmatmul.f32.vlgmr.msra.gmra.mxu0 %v3034_v56  ;;  %1195 = vmatpush.msra.mxu2 %v3281_v36 }
  0xaf   :  { %1310 = vmatpush.msrb.mxu0 %v3113_v45  ;;  %1154 = vmatpush.msra.mxu1 %v3040_v8  ;;  %v4097_v8 = vand.u32 4294901760, %v3134_v49  ;;  %v4106_v45 = vand.u32 4294901760, %v3247_v46 }
  0xb0   :  { %1290 = vmatpush.msra.mxu3 %v1289_v52  ;;  %1197 = vmatpush.msra.mxu2 %v3296_v7 }
  0xb1   :  { %1313 = vmatpush.msrb.mxu0 %v3134_v49  ;;  %1156 = vmatpush.msra.mxu1 %v3052_v27  ;;  %v4098_v27 = vand.u32 4294901760, %v3144_v38  ;;  %v4104_v49 = vand.u32 4294901760, %v3222_v26 }
  0xb2   :  { %1296 = vmatpush.msra.mxu3 %v1295_v60  ;;  %1203 = vmatmul.f32.vlgmr.msra.gmra.mxu2 %v1202_v34  ;;  %v3542_v34 = vand.u32 4294901760, %v105_v15 }
  0xb3   :  { %1316 = vmatpush.msrb.mxu0 %v3144_v38  ;;  %1404 = vmatpush.msrb.mxu2 %v4096_v53  ;;  %v116_v38 = vld [vmem:[#allocation2 + $0x278] sm:$0xff] }
  0xb4   :  { %1158 = vmatpush.msra.mxu1 %v3073_v5  ;;  %1302 = vmatpush.msra.mxu3 %v1301_v18  ;;  %v4099_v5 = vand.u32 4294901760, %v3152_v12 }
  0xb5   :  { %1304 = vmatmul.f32.vlgmr.msra.gmra.mxu3 %v3283_v30  ;;  %1319 = vmatpush.msrb.mxu0 %v3152_v12  ;;  %v113_v12 = vld [vmem:[#allocation2 + $0x260] sm:$0xff] }
  0xb6   :  { %1408 = vmatpush.msrb.mxu2 %v4097_v8  ;;  %1471 = vmatpush.msrb.mxu3 %v3086_v10 }
  0xb7   :  { %1160 = vmatpush.msra.mxu1 %v3092_v40  ;;  %1322 = vmatpush.msrb.mxu0 %v3163_v13  ;;  %v4102_v40 = vand.u32 4294901760, %v3196_v21 }
  0xb8   :  { %1162 = vmatmul.f32.vlgmr.msra.gmra.mxu1 %v3034_v56  ;;  %1412 = vmatpush.msrb.mxu2 %v4098_v27  ;;  %v4100_v56 = vand.u32 4294901760, %v3163_v13  ;;  %v114_v13 = vld [vmem:[#allocation2 + $0x268] sm:$0xff]  ;;  %v103_v27 = vld [vmem:[#allocation2 + $0x210] sm:$0xff] }
  0xb9   :  { %1363 = vmatpush.msrb.mxu1 %v3086_v10  ;;  %1473 = vmatpush.msrb.mxu3 %v3105_v54  ;;  %v4101_v10 = vand.u32 4294901760, %v3182_v57 }
  0xba   :  { %1325 = vmatpush.msrb.mxu0 %v3182_v57  ;;  %1416 = vmatpush.msrb.mxu2 %v4099_v5  ;;  %v112_v57 = vld [vmem:[#allocation2 + $0x258] sm:$0xff] }
  0xbb   :  { %1365 = vmatpush.msrb.mxu1 %v3105_v54  ;;  %1475 = vmatpush.msrb.mxu3 %v3122_v20  ;;  %v3416_v54 = vand.u32 4294901760, %v116_v38 }
  0xbc   :  { %1328 = vmatpush.msrb.mxu0 %v3196_v21  ;;  %1420 = vmatpush.msrb.mxu2 %v4100_v56 }
  0xbd   :  { %1367 = vmatpush.msrb.mxu1 %v3122_v20  ;;  %1477 = vmatpush.msrb.mxu3 %v3127_v3  ;;  %v4103_v20 = vand.u32 4294901760, %v3210_v2 }
  0xbe   :  { %1331 = vmatpush.msrb.mxu0 %v3210_v2  ;;  %1424 = vmatpush.msrb.mxu2 %v4101_v10  ;;  %v115_v2 = vld [vmem:[#allocation2 + $0x270] sm:$0xff]  ;;  %v3556_v10 = vand.u32 4294901760, %v104_v55 }
  0xbf   :  { %1369 = vmatpush.msrb.mxu1 %v3127_v3  ;;  %1479 = vmatpush.msrb.mxu3 %v3139_v63  ;;  %v3423_v3 = vand.u32 4294901760, %v115_v2 }
  0xc0   :  { %1334 = vmatpush.msrb.mxu0 %v3222_v26  ;;  %1428 = vmatpush.msrb.mxu2 %v4102_v40 }
  0xc1   :  { %1371 = vmatpush.msrb.mxu1 %v3139_v63  ;;  %1481 = vmatpush.msrb.mxu3 %v3156_v50  ;;  %v4105_v63 = vand.u32 4294901760, %v3234_v17  ;;  %v3443_v21 = vsub.f32 %v115_v2, %v3423_v3 }
  0xc2   :  { %1337 = vmatpush.msrb.mxu0 %v3234_v17  ;;  %1432 = vmatpush.msrb.mxu2 %v4103_v20  ;;  %v3560_v20 = vsub.f32 %v106_v0, %v3527_v14 }
  0xc3   :  { %1373 = vmatpush.msrb.mxu1 %v3156_v50  ;;  %1483 = vmatpush.msrb.mxu3 %v3171_v16  ;;  %v3430_v50 = vand.u32 4294901760, %v114_v13 }
  0xc4   :  { %1340 = vmatpush.msrb.mxu0 %v3247_v46  ;;  %1436 = vmatpush.msrb.mxu2 %v4104_v49  ;;  %v110_v46 = vld [vmem:[#allocation2 + $0x248] sm:$0xff] }
  0xc5   :  { %1375 = vmatpush.msrb.mxu1 %v3171_v16  ;;  %1485 = vmatpush.msrb.mxu3 %v3184_v42  ;;  %v3433_v16 = vsub.f32 %v116_v38, %v3416_v54 }
  0xc6   :  { %1343 = vmatpush.msrb.mxu0 %v3260_v37  ;;  %1440 = vmatpush.msrb.mxu2 %v4105_v63  ;;  %v3568_v63 = vand.u32 4294901760, %v103_v27 }
  0xc7   :  { %1377 = vmatpush.msrb.mxu1 %v3184_v42  ;;  %1487 = vmatpush.msrb.mxu3 %v3198_v9  ;;  %v3440_v42 = vand.u32 4294901760, %v113_v12  ;;  %v1550_v26 = vand.u32 4294901760, %v3433_v16 }
  0xc8   :  { %1346 = vmatpush.msrb.mxu0 %v3276_v11  ;;  %1444 = vmatpush.msrb.mxu2 %v4106_v45  ;;  %v3572_v45 = vsub.f32 %v105_v15, %v3542_v34  ;;  %v3597_v0 = vsub.f32 %v103_v27, %v3568_v63 }
  0xc9   :  { %1379 = vmatpush.msrb.mxu1 %v3198_v9  ;;  %1489 = vmatpush.msrb.mxu3 %v3212_v31  ;;  %v111_v9 = vld [vmem:[#allocation2 + $0x250] sm:$0xff]  ;;  %v3465_v37 = vsub.f32 %v113_v12, %v3440_v42 }
  0xca   :  { %1349 = vmatpush.msrb.mxu0 %v3294_v44  ;;  %1448 = vmatpush.msrb.mxu2 %v1275_v22  ;;  %v3459_v17 = vand.u32 4294901760, %v111_v9  ;;  %v109_v22 = vld [vmem:[#allocation2 + $0x240] sm:$0xff]  ;;  %v3478_v44 = vand.u32 4294901760, %v110_v46 }
  0xcb   :  { %1381 = vmatpush.msrb.mxu1 %v3212_v31  ;;  %1491 = vmatpush.msrb.mxu3 %v3224_v39  ;;  %v3448_v31 = vand.u32 4294901760, %v112_v57  ;;  %v3491_v6 = vand.u32 4294901760, %v109_v22 }
  0xcc   :  { %1352 = vmatpush.msrb.mxu0 %v3307_v32  ;;  %1452 = vmatpush.msrb.mxu2 %v1281_v62  ;;  %v3484_v32 = vsub.f32 %v111_v9, %v3459_v17  ;;  %v3505_v23 = vsub.f32 %v110_v46, %v3478_v44  ;;  %v4022_v46 = vand.u32 4294901760, %v3560_v20 }
  0xcd   :  { %1383 = vmatpush.msrb.mxu1 %v3224_v39  ;;  %1493 = vmatpush.msrb.mxu3 %v3236_v4  ;;  %v3454_v39 = vsub.f32 %v114_v13, %v3430_v50  ;;  %v3471_v11 = vsub.f32 %v112_v57, %v3448_v31  ;;  %v3518_v48 = vsub.f32 %v109_v22, %v3491_v6  ;;  %v102_v13 = vld [vmem:[#allocation2 + $0x208] sm:$0xff] }
  0xce   :  { %1355 = vmatpush.msrb.mxu0 %v3321_v58  ;;  %1456 = vmatpush.msrb.mxu2 %v1287_v24  ;;  %v4033_v24 = vand.u32 4294901760, %v3465_v37  ;;  %v4027_v33 = vand.u32 4294901760, %v3505_v23  ;;  %v3585_v22 = vsub.f32 %v104_v55, %v3556_v10 }
  0xcf   :  { %1385 = vmatpush.msrb.mxu1 %v3236_v4  ;;  %1495 = vmatpush.msrb.mxu3 %v3249_v29  ;;  %v1556_v4 = vand.u32 4294901760, %v3443_v21  ;;  %v1562_v62 = vand.u32 4294901760, %v3454_v39  ;;  %v4030_v58 = vand.u32 4294901760, %v3471_v11  ;;  %v4026_v18 = vand.u32 4294901760, %v3518_v48 }
  0xd0   :  { %1358 = vmatmul.f32.vlgmr.msrb.gmra.mxu0 %v3310_v59  ;;  %1460 = vmatpush.msrb.mxu2 %v1293_v28  ;;  %v3502_v28 = vand.u32 4294901760, %v108_v43  ;;  %v1569_v19 = vsub.f32 %v3465_v37, %v4033_v24  ;;  %v34_v59 = vld [vmem:[%s3977_s0 + $0x20] sm:$0xff]  ;;  %v1587_v56 = vsub.f32 %v3505_v23, %v4027_v33  ;;  %v124_v24 = vld [vmem:[#allocation2 + $0x2b8] sm:$0xff] }
  0xd1   :  { %1508 = vmatpush.msra.mxu0 %v3416_v54  ;;  %1387 = vmatpush.msrb.mxu1 %v3249_v29  ;;  %v1551_v29 = vsub.f32 %v3433_v16, %v1550_v26  ;;  %v1563_v1 = vsub.f32 %v3454_v39, %v1562_v62  ;;  %v3550_v5 = vand.u32 4294901760, %v34_v59  ;;  %v1593_v38 = vsub.f32 %v3518_v48, %v4026_v18 }
  0xd2   :  { %1497 = vmatpush.msrb.mxu3 %v3268_v35  ;;  %1464 = vmatpush.msrb.mxu2 %v1299_v41  ;;  %v3515_v41 = vand.u32 4294901760, %v107_v47  ;;  %v3531_v52 = vsub.f32 %v108_v43, %v3502_v28  ;;  %v1570_v60 = vand.u32 4294901760, %v1569_v19  ;;  %v1588_v57 = vand.u32 4294901760, %v1587_v56 }
  0xd3   :  { %1510 = vmatpush.msra.mxu0 %v3423_v3  ;;  %1389 = vmatpush.msrb.mxu1 %v3268_v35  ;;  %v1557_v35 = vsub.f32 %v3443_v21, %v1556_v4  ;;  %v1552_v51 = vand.u32 4294901760, %v1551_v29  ;;  %v1564_v25 = vand.u32 4294901760, %v1563_v1  ;;  %v3577_v12 = vsub.f32 %v34_v59, %v3550_v5  ;;  %v132_v29 = vld [vmem:[#allocation2 + $0x2f8] sm:$0xff] }
  0xd4   :  { %1499 = vmatpush.msrb.mxu3 %v3281_v36  ;;  %1466 = vmatmul.f32.vlgmr.msrb.gmra.mxu2 %v3283_v30  ;;  %v3546_v53 = vsub.f32 %v107_v47, %v3515_v41  ;;  %v4025_v40 = vand.u32 4294901760, %v3531_v52  ;;  %v3589_v43 = vand.u32 4294901760, %v102_v13  ;;  %v1594_v47 = vand.u32 4294901760, %v1593_v38  ;;  %v129_v38 = vld [vmem:[#allocation2 + $0x2e0] sm:$0xff] }
  0xd5   :  { %1512 = vmatpush.msra.mxu0 %v3430_v50  ;;  %1651 = vmatpush.msra.mxu2 %v3433_v16  ;;  %v4021_v1 = vand.u32 4294901760, %v3572_v45  ;;  %v3602_v19 = vand.u32 4294901760, %v132_v29  ;;  %v4028_v56 = vand.u32 4294901760, %v3597_v0 }
  0xd6   :  { %1391 = vmatpush.msrb.mxu1 %v3281_v36  ;;  %1501 = vmatpush.msrb.mxu3 %v3296_v7  ;;  %v4029_v36 = vand.u32 4294901760, %v3484_v32  ;;  %v4024_v2 = vand.u32 4294901760, %v3546_v53  ;;  %v1599_v9 = vsub.f32 %v3531_v52, %v4025_v40  ;;  %v3614_v55 = vsub.f32 %v102_v13, %v3589_v43 }
  0xd7   :  { %1503 = vmatmul.f32.vlgmr.msrb.gmra.mxu3 %v3283_v30  ;;  %1514 = vmatpush.msra.mxu0 %v3440_v42  ;;  %v1558_v30 = vand.u32 4294901760, %v1557_v35  ;;  %v101_v35 = vld [vmem:[#allocation2 + $0x200] sm:$0xff]  ;;  %v1617_v27 = vsub.f32 %v3572_v45, %v4021_v1 }
  0xd8   :  { %1654 = vmatpush.msra.mxu2 %v3443_v21  ;;  %1704 = vmatpush.msra.mxu3 %v3416_v54  ;;  %v1600_v15 = vand.u32 4294901760, %v1599_v9  ;;  %v3608_v59 = vand.u32 4294901760, %v101_v35 }
  0xd9   :  { %1393 = vmatpush.msrb.mxu1 %v3296_v7  ;;  %1516 = vmatpush.msra.mxu0 %v3448_v31  ;;  %v1575_v7 = vsub.f32 %v3471_v11, %v4030_v58 }
  0xda   :  { %1397 = vmatmul.f32.vlgmr.msrb.gmra.mxu1 %v1200_v61  ;;  %1657 = vmatpush.msra.mxu2 %v3454_v39  ;;  %v1581_v61 = vsub.f32 %v3484_v32, %v4029_v36 }
  0xdb   :  { %1553 = vmatpush.msra.mxu1 %v1552_v51  ;;  %1706 = vmatpush.msra.mxu3 %v3423_v3  ;;  %v1576_v8 = vand.u32 4294901760, %v1575_v7  ;;  %v1605_v51 = vsub.f32 %v3546_v53, %v4024_v2  ;;  %v131_v7 = vld [vmem:[#allocation2 + $0x2f0] sm:$0xff] }
  0xdc   :  { %1518 = vmatpush.msra.mxu0 %v3459_v17  ;;  %1660 = vmatpush.msra.mxu2 %v3465_v37  ;;  %v1582_v49 = vand.u32 4294901760, %v1581_v61  ;;  %v4023_v61 = vand.u32 4294901760, %v3585_v22 }
  0xdd   :  { %1559 = vmatpush.msra.mxu1 %v1558_v30  ;;  %1708 = vmatpush.msra.mxu3 %v3430_v50  ;;  %v4035_v30 = vand.u32 4294901760, %v3577_v12 }
  0xde   :  { %1520 = vmatpush.msra.mxu0 %v3478_v44  ;;  %1663 = vmatpush.msra.mxu2 %v3471_v11 }
  0xdf   :  { %1565 = vmatpush.msra.mxu1 %v1564_v25  ;;  %1710 = vmatpush.msra.mxu3 %v3440_v42  ;;  %v1611_v25 = vsub.f32 %v3560_v20, %v4022_v46  ;;  %v1542_v13 = vsub.f32 %v3577_v12, %v4035_v30  ;;  %v128_v46 = vld [vmem:[#allocation2 + $0x2d8] sm:$0xff]  ;;  %v123_v30 = vld [vmem:[#allocation2 + $0x2b0] sm:$0xff] }
  0xe0   :  { %1522 = vmatpush.msra.mxu0 %v3491_v6  ;;  %1666 = vmatpush.msra.mxu2 %v3484_v32  ;;  %v3655_v18 = vand.u32 4294901760, %v128_v46 }
  0xe1   :  { %1571 = vmatpush.msra.mxu1 %v1570_v60  ;;  %1712 = vmatpush.msra.mxu3 %v3448_v31  ;;  %v130_v60 = vld [vmem:[#allocation2 + $0x2e8] sm:$0xff]  ;;  %v1612_v9 = vand.u32 4294901760, %v1611_v25  ;;  %v1618_v25 = vand.u32 4294901760, %v1617_v27  ;;  %v1543_v2 = vand.u32 4294901760, %v1542_v13 }
  0xe2   :  { %1524 = vmatpush.msra.mxu0 %v3502_v28  ;;  %1669 = vmatpush.msra.mxu2 %v3505_v23  ;;  %v3638_v1 = vand.u32 4294901760, %v130_v60 }
  0xe3   :  { %1577 = vmatpush.msra.mxu1 %v1576_v8  ;;  %1714 = vmatpush.msra.mxu3 %v3459_v17  ;;  %v1606_v8 = vand.u32 4294901760, %v1605_v51  ;;  %v3636_v51 = vsub.f32 %v101_v35, %v3608_v59  ;;  %v1629_v35 = vsub.f32 %v3597_v0, %v4028_v56 }
  0xe4   :  { %1526 = vmatpush.msra.mxu0 %v3515_v41  ;;  %1672 = vmatpush.msra.mxu2 %v3518_v48  ;;  %v3660_v56 = vsub.f32 %v130_v60, %v3638_v1 }
  0xe5   :  { %1583 = vmatpush.msra.mxu1 %v1582_v49  ;;  %1716 = vmatpush.msra.mxu3 %v3478_v44  ;;  %v3621_v49 = vand.u32 4294901760, %v131_v7  ;;  %v4034_v33 = vand.u32 4294901760, %v3636_v51 }
  0xe6   :  { %1528 = vmatpush.msra.mxu0 %v3527_v14  ;;  %1675 = vmatpush.msra.mxu2 %v3531_v52 }
  0xe7   :  { %1589 = vmatpush.msra.mxu1 %v1588_v57  ;;  %1718 = vmatpush.msra.mxu3 %v3491_v6  ;;  %v3629_v57 = vsub.f32 %v132_v29, %v3602_v19  ;;  %v4031_v29 = vand.u32 4294901760, %v3614_v55 }
  0xe8   :  { %1530 = vmatpush.msra.mxu0 %v3542_v34  ;;  %1678 = vmatpush.msra.mxu2 %v3546_v53 }
  0xe9   :  { %1595 = vmatpush.msra.mxu1 %v1594_v47  ;;  %1720 = vmatpush.msra.mxu3 %v3502_v28  ;;  %v1623_v47 = vsub.f32 %v3585_v22, %v4023_v61  ;;  %v3650_v61 = vsub.f32 %v131_v7, %v3621_v49  ;;  %v4032_v40 = vand.u32 4294901760, %v3629_v57  ;;  %v1635_v7 = vsub.f32 %v3614_v55, %v4031_v29 }
  0xea   :  { %1532 = vmatpush.msra.mxu0 %v3556_v10  ;;  %1681 = vmatpush.msra.mxu2 %v3560_v20  ;;  %v3679_v29 = vsub.f32 %v128_v46, %v3655_v18 }
  0xeb   :  { %1601 = vmatpush.msra.mxu1 %v1600_v15  ;;  %1722 = vmatpush.msra.mxu3 %v3515_v41  ;;  %v3643_v15 = vand.u32 4294901760, %v129_v38  ;;  %v1624_v27 = vand.u32 4294901760, %v1623_v47  ;;  %v1630_v47 = vand.u32 4294901760, %v1629_v35  ;;  %v4037_v36 = vand.u32 4294901760, %v3650_v61 }
  0xec   :  { %1534 = vmatpush.msra.mxu0 %v3568_v63  ;;  %1684 = vmatpush.msra.mxu2 %v3572_v45  ;;  %v1892_v58 = vsub.f32 %v3629_v57, %v4032_v40  ;;  %v1636_v40 = vand.u32 4294901760, %v1635_v7 }
  0xed   :  { %1607 = vmatpush.msra.mxu1 %v1606_v8  ;;  %1724 = vmatpush.msra.mxu3 %v3527_v14  ;;  %v127_v8 = vld [vmem:[#allocation2 + $0x2d0] sm:$0xff]  ;;  %v3668_v13 = vsub.f32 %v129_v38, %v3643_v15  ;;  %v125_v38 = vld [vmem:[#allocation2 + $0x2c0] sm:$0xff]  ;;  %v1898_v16 = vsub.f32 %v3650_v61, %v4037_v36 }
  0xee   :  { %1536 = vmatpush.msra.mxu0 %v3589_v43  ;;  %1687 = vmatpush.msra.mxu2 %v3585_v22  ;;  %v3672_v60 = vand.u32 4294901760, %v127_v8  ;;  %v1893_v7 = vand.u32 4294901760, %v1892_v58  ;;  %v4107_v58 = vand.u32 4294901760, %v3577_v12 }
  0xef   :  { %1613 = vmatpush.msra.mxu1 %v1612_v9  ;;  %1726 = vmatpush.msra.mxu3 %v3542_v34  ;;  %v126_v9 = vld [vmem:[#allocation2 + $0x2c8] sm:$0xff]  ;;  %v4038_v46 = vand.u32 4294901760, %v3668_v13 }
  0xf0   :  { %1538 = vmatpush.msra.mxu0 %v3608_v59  ;;  %1690 = vmatpush.msra.mxu2 %v3597_v0  ;;  %v3687_v35 = vand.u32 4294901760, %v126_v9 }
  0xf1   :  { %1619 = vmatpush.msra.mxu1 %v1618_v25  ;;  %1728 = vmatpush.msra.mxu3 %v3556_v10  ;;  %v1641_v25 = vsub.f32 %v3636_v51, %v4034_v33  ;;  %v4039_v33 = vand.u32 4294901760, %v3679_v29  ;;  %v1910_v39 = vsub.f32 %v3668_v13, %v4038_v46 }
  0xf2   :  { %1544 = vmatmul.f32.vlgmr.msra.gmra.mxu0 %v1543_v2  ;;  %1693 = vmatpush.msra.mxu2 %v3614_v55  ;;  %v4036_v2 = vand.u32 4294901760, %v3660_v56 }
  0xf3   :  { %1745 = vmatpush.msrb.mxu0 %v1550_v26  ;;  %1625 = vmatpush.msra.mxu1 %v1624_v27  ;;  %v3698_v26 = vsub.f32 %v127_v8, %v3672_v60  ;;  %v3700_v27 = vand.u32 4294901760, %v125_v38  ;;  %v1642_v21 = vand.u32 4294901760, %v1641_v25  ;;  %v3712_v8 = vsub.f32 %v126_v9, %v3687_v35  ;;  %v120_v9 = vld [vmem:[#allocation2 + $0x298] sm:$0xff] }
  0xf4   :  { %1730 = vmatpush.msra.mxu3 %v3568_v63  ;;  %1696 = vmatpush.msra.mxu2 %v3636_v51  ;;  %v4108_v25 = vand.u32 4294901760, %v3465_v37  ;;  %v1916_v46 = vsub.f32 %v3679_v29, %v4039_v33  ;;  %v4109_v37 = vand.u32 4294901760, %v3471_v11  ;;  %v4111_v33 = vand.u32 4294901760, %v3484_v32 }
  0xf5   :  { %1749 = vmatpush.msrb.mxu0 %v1556_v4  ;;  %1631 = vmatpush.msra.mxu1 %v1630_v47  ;;  %v1904_v4 = vsub.f32 %v3660_v56, %v4036_v2  ;;  %v3714_v47 = vand.u32 4294901760, %v124_v24  ;;  %v1899_v2 = vand.u32 4294901760, %v1898_v16  ;;  %v3726_v36 = vsub.f32 %v125_v38, %v3700_v27 }
  0xf6   :  { %1732 = vmatpush.msra.mxu3 %v3589_v43  ;;  %1699 = vmatmul.f32.vlgmr.msra.gmra.mxu2 %v3577_v12  ;;  %v121_v12 = vld [vmem:[#allocation2 + $0x2a0] sm:$0xff]  ;;  %v4110_v11 = vand.u32 4294901760, %v3698_v26  ;;  %v4112_v32 = vand.u32 4294901760, %v3505_v23  ;;  %v35_v23 = vld [vmem:[%s3977_s0 + $0x28] sm:$0xff] }
  0xf7   :  { %1753 = vmatpush.msrb.mxu0 %v1562_v62  ;;  %1849 = vmatpush.msrb.mxu2 %v3602_v19  ;;  %v122_v62 = vld [vmem:[#allocation2 + $0x2a8] sm:$0xff]  ;;  %v1905_v16 = vand.u32 4294901760, %v1904_v4  ;;  %v3738_v38 = vsub.f32 %v124_v24, %v3714_v47  ;;  %v119_v4 = vld [vmem:[#allocation2 + $0x290] sm:$0xff] }
  0xf8   :  { %1637 = vmatpush.msra.mxu1 %v1636_v40  ;;  %1734 = vmatpush.msra.mxu3 %v3608_v59  ;;  %v3728_v40 = vand.u32 4294901760, %v123_v30 }
  0xf9   :  { %1738 = vmatmul.f32.vlgmr.msra.gmra.mxu3 %v4107_v58  ;;  %1757 = vmatpush.msrb.mxu0 %v4108_v25  ;;  %v4040_v58 = vand.u32 4294901760, %v3712_v8  ;;  %v3740_v25 = vand.u32 4294901760, %v122_v62 }
  0xfa   :  { %1851 = vmatpush.msrb.mxu2 %v3621_v49  ;;  %1894 = vmatpush.msrb.mxu3 %v1893_v7  ;;  %v1911_v7 = vand.u32 4294901760, %v1910_v39  ;;  %v3750_v24 = vsub.f32 %v123_v30, %v3728_v40  ;;  %v1917_v39 = vand.u32 4294901760, %v1916_v46 }
  0xfb   :  { %1643 = vmatpush.msra.mxu1 %v1642_v21  ;;  %1761 = vmatpush.msrb.mxu0 %v4109_v37  ;;  %v1922_v21 = vsub.f32 %v3698_v26, %v4110_v11  ;;  %v3752_v37 = vand.u32 4294901760, %v121_v12  ;;  %v3763_v30 = vsub.f32 %v122_v62, %v3740_v25  ;;  %v3765_v11 = vand.u32 4294901760, %v120_v9 }
  0xfc   :  { %1645 = vmatmul.f32.vlgmr.msra.gmra.mxu1 %v3550_v5  ;;  %1853 = vmatpush.msrb.mxu2 %v3638_v1 }
  0xfd   :  { %1812 = vmatpush.msrb.mxu1 %v3416_v54  ;;  %1900 = vmatpush.msrb.mxu3 %v1899_v2  ;;  %v1928_v54 = vsub.f32 %v3712_v8, %v4040_v58  ;;  %v4041_v2 = vand.u32 4294901760, %v3738_v38  ;;  %v3776_v62 = vsub.f32 %v121_v12, %v3752_v37  ;;  %v118_v58 = vld [vmem:[#allocation2 + $0x288] sm:$0xff] }
  0xfe   :  { %1765 = vmatpush.msrb.mxu0 %v4111_v33  ;;  %1855 = vmatpush.msrb.mxu2 %v3643_v15  ;;  %v4113_v33 = vand.u32 4294901760, %v3726_v36 }
  0xff   :  { %1814 = vmatpush.msrb.mxu1 %v3423_v3  ;;  %1906 = vmatpush.msrb.mxu3 %v1905_v16  ;;  %v1923_v3 = vand.u32 4294901760, %v1922_v21  ;;  %v1940_v12 = vsub.f32 %v3738_v38, %v4041_v2  ;;  %v117_v16 = vld [vmem:[#allocation2 + $0x280] sm:$0xff]  ;;  %v4117_v21 = vand.u32 4294901760, %v3546_v53  ;;  %v4119_v53 = vand.u32 4294901760, %v3560_v20 }
 0x100   :  { %1769 = vmatpush.msrb.mxu0 %v4112_v32  ;;  %1857 = vmatpush.msrb.mxu2 %v3655_v18  ;;  %v1934_v46 = vsub.f32 %v3726_v36, %v4113_v33  ;;  %v4114_v32 = vand.u32 4294901760, %v3518_v48  ;;  %v3792_v33 = vsub.f32 %v120_v9, %v3765_v11  ;;  %v4115_v48 = vand.u32 4294901760, %v3531_v52 }
 0x101   :  { %1816 = vmatpush.msrb.mxu1 %v3430_v50  ;;  %1912 = vmatpush.msrb.mxu3 %v1911_v7  ;;  %v3784_v50 = vand.u32 4294901760, %v119_v4  ;;  %v1929_v7 = vand.u32 4294901760, %v1928_v54  ;;  %v4116_v54 = vand.u32 4294901760, %v3750_v24  ;;  %v1957_v9 = vand.u32 4294901760, %v3776_v62 }
 0x102   :  { %1773 = vmatpush.msrb.mxu0 %v4114_v32  ;;  %1859 = vmatpush.msrb.mxu2 %v3672_v60  ;;  %v3797_v32 = vand.u32 4294901760, %v118_v58 }
 0x103   :  { %1818 = vmatpush.msrb.mxu1 %v3440_v42  ;;  %1918 = vmatpush.msrb.mxu3 %v1917_v39  ;;  %v3799_v42 = vand.u32 4294901760, %v35_v23  ;;  %v1935_v39 = vand.u32 4294901760, %v1934_v46  ;;  %v1946_v2 = vsub.f32 %v3750_v24, %v4116_v54  ;;  %v3810_v52 = vsub.f32 %v119_v4, %v3784_v50 }
 0x104   :  { %1777 = vmatpush.msrb.mxu0 %v4115_v48  ;;  %1861 = vmatpush.msrb.mxu2 %v3687_v35  ;;  %v3812_v48 = vand.u32 4294901760, %v117_v16  ;;  %v1963_v54 = vand.u32 4294901760, %v3792_v33  ;;  %v3823_v4 = vsub.f32 %v118_v58, %v3797_v32 }
 0x105   :  { %1820 = vmatpush.msrb.mxu1 %v3448_v31  ;;  %1924 = vmatpush.msrb.mxu3 %v1923_v3  ;;  %v1941_v31 = vand.u32 4294901760, %v1940_v12  ;;  %v4118_v3 = vand.u32 4294901760, %v3763_v30  ;;  %v4120_v12 = vand.u32 4294901760, %v3572_v45  ;;  %v1969_v20 = vand.u32 4294901760, %v3810_v52 }
 0x106   :  { %1781 = vmatpush.msrb.mxu0 %v4117_v21  ;;  %1863 = vmatpush.msrb.mxu2 %v3700_v27  ;;  %v3826_v21 = vsub.f32 %v35_v23, %v3799_v42  ;;  %v3837_v58 = vsub.f32 %v117_v16, %v3812_v48  ;;  %v4121_v23 = vand.u32 4294901760, %v3585_v22  ;;  %v1975_v45 = vand.u32 4294901760, %v3823_v4 }
 0x107   :  { %1822 = vmatpush.msrb.mxu1 %v3459_v17  ;;  %1930 = vmatpush.msrb.mxu3 %v1929_v7  ;;  %v1952_v46 = vsub.f32 %v3763_v30, %v4118_v3  ;;  %v1947_v17 = vand.u32 4294901760, %v1946_v2  ;;  %v1958_v7 = vsub.f32 %v3776_v62, %v1957_v9  ;;  %v1964_v2 = vsub.f32 %v3792_v33, %v1963_v54 }
 0x108   :  { %1785 = vmatpush.msrb.mxu0 %v4119_v53  ;;  %1865 = vmatpush.msrb.mxu2 %v3714_v47  ;;  %v1970_v22 = vsub.f32 %v3810_v52, %v1969_v20 }
 0x109   :  { %1824 = vmatpush.msrb.mxu1 %v3478_v44  ;;  %1936 = vmatpush.msrb.mxu3 %v1935_v39  ;;  %v1953_v44 = vand.u32 4294901760, %v1952_v46  ;;  %v1882_v39 = vand.u32 4294901760, %v3826_v21  ;;  %v1959_v16 = vand.u32 4294901760, %v1958_v7  ;;  %v1965_v3 = vand.u32 4294901760, %v1964_v2 }
 0x10a   :  { %1789 = vmatpush.msrb.mxu0 %v4120_v12  ;;  %1867 = vmatpush.msrb.mxu2 %v3728_v40  ;;  %v4123_v46 = vand.u32 4294901760, %v3614_v55  ;;  %v1971_v55 = vand.u32 4294901760, %v1970_v22 }
 0x10b   :  { %1826 = vmatpush.msrb.mxu1 %v3491_v6  ;;  %1942 = vmatpush.msrb.mxu3 %v1941_v31  ;;  %v4122_v6 = vand.u32 4294901760, %v3597_v0  ;;  %v1981_v31 = vand.u32 4294901760, %v3837_v58  ;;  %v1883_v0 = vsub.f32 %v3826_v21, %v1882_v39 }
 0x10c   :  { %1793 = vmatpush.msrb.mxu0 %v4121_v23  ;;  %1869 = vmatpush.msrb.mxu2 %v3740_v25 }
 0x10d   :  { %1828 = vmatpush.msrb.mxu1 %v3502_v28  ;;  %1948 = vmatpush.msrb.mxu3 %v1947_v17  ;;  %v1976_v28 = vsub.f32 %v3823_v4, %v1975_v45  ;;  %v1982_v53 = vsub.f32 %v3837_v58, %v1981_v31 }
 0x10e   :  { %1797 = vmatpush.msrb.mxu0 %v4122_v6  ;;  %1871 = vmatpush.msrb.mxu2 %v3752_v37 }
 0x10f   :  { %1830 = vmatpush.msrb.mxu1 %v3515_v41  ;;  %1954 = vmatpush.msrb.mxu3 %v1953_v44  ;;  %v4124_v41 = vand.u32 4294901760, %v3636_v51  ;;  %v1977_v17 = vand.u32 4294901760, %v1976_v28  ;;  %v1983_v51 = vand.u32 4294901760, %v1982_v53 }
 0x110   :  { %1801 = vmatpush.msrb.mxu0 %v4123_v46  ;;  %1873 = vmatpush.msrb.mxu2 %v3765_v11 }
 0x111   :  { %1832 = vmatpush.msrb.mxu1 %v3527_v14  ;;  %1960 = vmatpush.msrb.mxu3 %v1959_v16  ;;  %v1884_v14 = vand.u32 4294901760, %v1883_v0 }
 0x112   :  { %1805 = vmatpush.msrb.mxu0 %v4124_v41  ;;  %1875 = vmatpush.msrb.mxu2 %v3784_v50 }
 0x113   :  { %1834 = vmatpush.msrb.mxu1 %v3542_v34  ;;  %1966 = vmatpush.msrb.mxu3 %v1965_v3  ;;  %v4125_v34 = vand.u32 4294901760, %v3629_v57 }
 0x114   :  { %1807 = vmatmul.f32.vlgmr.msrb.gmra.mxu0 %v3550_v5  ;;  %1877 = vmatpush.msrb.mxu2 %v3797_v32 }
 0x115   :  { %1992 = vmatpush.msra.mxu0 %v3629_v57  ;;  %1836 = vmatpush.msrb.mxu1 %v3556_v10  ;;  %v4126_v10 = vand.u32 4294901760, %v3650_v61  ;;  %v4133_v57 = vand.u32 4294901760, %v3738_v38 }
 0x116   :  { %1972 = vmatpush.msrb.mxu3 %v1971_v55  ;;  %1879 = vmatpush.msrb.mxu2 %v3812_v48 }
 0x117   :  { %1995 = vmatpush.msra.mxu0 %v3650_v61  ;;  %1838 = vmatpush.msrb.mxu1 %v3568_v63  ;;  %v4127_v63 = vand.u32 4294901760, %v3660_v56  ;;  %v4132_v61 = vand.u32 4294901760, %v3726_v36 }
 0x118   :  { %1978 = vmatpush.msrb.mxu3 %v1977_v17  ;;  %1885 = vmatmul.f32.vlgmr.msrb.gmra.mxu2 %v1884_v14 }
 0x119   :  { %1998 = vmatpush.msra.mxu0 %v3660_v56  ;;  %2086 = vmatpush.msra.mxu2 %v4125_v34  ;;  %v134_v56 = vld [vmem:[#allocation2 + $0x308] sm:$0xff] }
 0x11a   :  { %1840 = vmatpush.msrb.mxu1 %v3589_v43  ;;  %1984 = vmatpush.msrb.mxu3 %v1983_v51  ;;  %v4128_v43 = vand.u32 4294901760, %v3668_v13 }
 0x11b   :  { %1986 = vmatmul.f32.vlgmr.msrb.gmra.mxu3 %v3799_v42  ;;  %2001 = vmatpush.msra.mxu0 %v3668_v13 }
 0x11c   :  { %2090 = vmatpush.msra.mxu2 %v4126_v10  ;;  %2153 = vmatpush.msra.mxu3 %v3602_v19 }
 0x11d   :  { %1842 = vmatpush.msrb.mxu1 %v3608_v59  ;;  %2004 = vmatpush.msra.mxu0 %v3679_v29  ;;  %v4131_v59 = vand.u32 4294901760, %v3712_v8 }
 0x11e   :  { %1844 = vmatmul.f32.vlgmr.msrb.gmra.mxu1 %v3550_v5  ;;  %2094 = vmatpush.msra.mxu2 %v4127_v63  ;;  %v4129_v5 = vand.u32 4294901760, %v3679_v29  ;;  %v133_v29 = vld [vmem:[#allocation2 + $0x300] sm:$0xff] }
 0x11f   :  { %2045 = vmatpush.msra.mxu1 %v3602_v19  ;;  %2155 = vmatpush.msra.mxu3 %v3621_v49  ;;  %v4130_v19 = vand.u32 4294901760, %v3698_v26  ;;  %v2205_v13 = vand.u32 4294901760, %v133_v29 }
 0x120   :  { %2007 = vmatpush.msra.mxu0 %v3698_v26  ;;  %2098 = vmatpush.msra.mxu2 %v4128_v43 }
 0x121   :  { %2047 = vmatpush.msra.mxu1 %v3621_v49  ;;  %2157 = vmatpush.msra.mxu3 %v3638_v1 }
 0x122   :  { %2010 = vmatpush.msra.mxu0 %v3712_v8  ;;  %2102 = vmatpush.msra.mxu2 %v4129_v5 }
 0x123   :  { %2049 = vmatpush.msra.mxu1 %v3638_v1  ;;  %2159 = vmatpush.msra.mxu3 %v3643_v15  ;;  %v36_v1 = vld [vmem:[%s3977_s0 + $0x30] sm:$0xff] }
 0x124   :  { %2013 = vmatpush.msra.mxu0 %v3726_v36  ;;  %2106 = vmatpush.msra.mxu2 %v4130_v19  ;;  %v141_v49 = vsel %vm139_vm0, %v36_v1, 0  ;;  %v4134_v36 = vand.u32 4294901760, %v3750_v24 }
 0x125   :  { %2051 = vmatpush.msra.mxu1 %v3643_v15  ;;  %2161 = vmatpush.msra.mxu3 %v3655_v18  ;;  %v2207_v15 = vand.u32 4294901760, %v141_v49 }
 0x126   :  { %2016 = vmatpush.msra.mxu0 %v3738_v38  ;;  %2110 = vmatpush.msra.mxu2 %v4131_v59 }
 0x127   :  { %2053 = vmatpush.msra.mxu1 %v3655_v18  ;;  %2163 = vmatpush.msra.mxu3 %v3672_v60  ;;  %v2203_v18 = vand.u32 4294901760, %v134_v56  ;;  %v2208_v26 = vsub.f32 %v141_v49, %v2207_v15 }
 0x128   :  { %2019 = vmatpush.msra.mxu0 %v3750_v24  ;;  %2114 = vmatpush.msra.mxu2 %v4132_v61 }
 0x129   :  { %2055 = vmatpush.msra.mxu1 %v3672_v60  ;;  %2165 = vmatpush.msra.mxu3 %v3687_v35  ;;  %v4135_v60 = vand.u32 4294901760, %v3763_v30 }
 0x12a   :  { %2022 = vmatpush.msra.mxu0 %v3763_v30  ;;  %2118 = vmatpush.msra.mxu2 %v4133_v57 }
 0x12b   :  { %2057 = vmatpush.msra.mxu1 %v3687_v35  ;;  %2167 = vmatpush.msra.mxu3 %v3700_v27  ;;  %v2231_v35 = vsub.f32 %v134_v56, %v2203_v18 }
 0x12c   :  { %2025 = vmatpush.msra.mxu0 %v3776_v62  ;;  %2122 = vmatpush.msra.mxu2 %v4134_v36  ;;  %v2367_v62 = vld [vmem:[%s3979_s2] ss:$0 sm:$0xff] }
 0x12d   :  { %2059 = vmatpush.msra.mxu1 %v3700_v27  ;;  %2169 = vmatpush.msra.mxu3 %v3714_v47  ;;  %v2237_v27 = vsub.f32 %v133_v29, %v2205_v13  ;;  %v2232_v8 = vand.u32 4294901760, %v2231_v35 }
 0x12e   :  { %2028 = vmatpush.msra.mxu0 %v3792_v33  ;;  %2126 = vmatpush.msra.mxu2 %v4135_v60 }
 0x12f   :  { %2061 = vmatpush.msra.mxu1 %v3714_v47  ;;  %2171 = vmatpush.msra.mxu3 %v3728_v40  ;;  %v2209_v47 = vand.u32 4294901760, %v2208_v26  ;;  %v2233_v38 = vsub.f32 %v2231_v35, %v2232_v8 }
 0x130   :  { %2031 = vmatpush.msra.mxu0 %v3810_v52  ;;  %2130 = vmatpush.msra.mxu2 %v1957_v9  ;;  %v336_v9 = vpop.f32.mrf.mxu2 }
 0x131   :  { %2063 = vmatpush.msra.mxu1 %v3728_v40  ;;  %2173 = vmatpush.msra.mxu3 %v3740_v25  ;;  %v2238_v40 = vand.u32 4294901760, %v2237_v27 }
 0x132   :  { %2034 = vmatpush.msra.mxu0 %v3823_v4  ;;  %2134 = vmatpush.msra.mxu2 %v1963_v54 }
 0x133   :  { %2065 = vmatpush.msra.mxu1 %v3740_v25  ;;  %2175 = vmatpush.msra.mxu3 %v3752_v37  ;;  %v2210_v25 = vsub.f32 %v2208_v26, %v2209_v47  ;;  %v2239_v24 = vsub.f32 %v2237_v27, %v2238_v40 }
 0x134   :  { %2037 = vmatpush.msra.mxu0 %v3837_v58  ;;  %2138 = vmatpush.msra.mxu2 %v1969_v20 }
 0x135   :  { %2067 = vmatpush.msra.mxu1 %v3752_v37  ;;  %2177 = vmatpush.msra.mxu3 %v3765_v11  ;;  %v2234_v37 = vand.u32 4294901760, %v2233_v38  ;;  %v2211_v30 = vand.u32 4294901760, %v2210_v25 }
 0x136   :  { %2040 = vmatmul.f32.vlgmr.msra.gmra.mxu0 %v3826_v21  ;;  %2142 = vmatpush.msra.mxu2 %v1975_v45 }
 0x137   :  { %2069 = vmatpush.msra.mxu1 %v3765_v11  ;;  %2179 = vmatpush.msra.mxu3 %v3784_v50  ;;  %v2240_v11 = vand.u32 4294901760, %v2239_v24 }
 0x138   :  { %2146 = vmatpush.msra.mxu2 %v1981_v31  ;;  %2204 = vmatpush.msrb.mxu0 %v2203_v18  ;;  %v522_v20 = vpop.f32.mrf.mxu2 }
 0x139   :  { %2071 = vmatpush.msra.mxu1 %v3784_v50  ;;  %2181 = vmatpush.msra.mxu3 %v3797_v32  ;;  %v181_v50 = vpop.f32.mrf.mxu0 }
 0x13a   :  { %2148 = vmatmul.f32.vlgmr.msra.gmra.mxu2 %v3799_v42  ;;  %2206 = vmatpush.msrb.mxu0 %v2205_v13  ;;  %v182_v33 = vadd.f32 %v2367_v62, %v181_v50 }
 0x13b   :  { %2263 = vmatpush.msrb.mxu2 %v2231_v35  ;;  %2073 = vmatpush.msra.mxu1 %v3797_v32  ;;  %v282_v32 = vpop.f32.mrf.mxu1 }
 0x13c   :  { %2183 = vmatpush.msra.mxu3 %v3812_v48  ;;  %2315 = vmatpush.msra.mxu0 %v2232_v8 }
 0x13d   :  { %2185 = vmatmul.f32.vlgmr.msra.gmra.mxu3 %v3799_v42  ;;  %2075 = vmatpush.msra.mxu1 %v3812_v48  ;;  %v283_v42 = vadd.f32 %v282_v32, %v182_v33  ;;  %v375_v48 = vpop.f32.mrf.mxu3 }
 0x13e   :  { %2288 = vmatpush.msrb.mxu3 %v2203_v18  ;;  %2079 = vmatmul.f32.vlgmr.msra.gmra.mxu1 %v1882_v39 }
 0x13f   :  { %2235 = vmatpush.msrb.mxu1 %v2234_v37  ;;  %2266 = vmatpush.msrb.mxu2 %v2237_v27  ;;  %v337_v52 = vadd.f32 %v336_v9, %v283_v42 }
 0x140   :  { %2290 = vmatpush.msrb.mxu3 %v2205_v13  ;;  %2212 = vmatmul.f32.vlgmr.msrb.gmra.mxu0 %v2211_v30  ;;  %v785_v6 = vpop.f32.mrf.mxu2 }
 0x141   :  { %2241 = vmatpush.msrb.mxu1 %v2240_v11  ;;  %2319 = vmatpush.msra.mxu0 %v2238_v40  ;;  %v376_v54 = vadd.f32 %v375_v48, %v337_v52  ;;  %v444_v4 = vpop.f32.mrf.mxu0 }
 0x142   :  { %2269 = vmatmul.f32.vlgmr.msrb.gmra.mxu2 %v2208_v26 }
 0x143   :  { %2340 = vmatpush.msra.mxu1 %v2203_v18  ;;  %v445_v21 = vadd.f32 %v444_v4, %v376_v54  ;;  %v481_v7 = vpop.f32.mrf.mxu1 }
 0x145   :  { %2342 = vmatpush.msra.mxu1 %v2205_v13  ;;  %2294 = vmatmul.f32.vlgmr.msrb.gmra.mxu3 %v2209_v47  ;;  %v482_v12 = vadd.f32 %v481_v7, %v445_v21  ;;  %v623_v44 = vpop.f32.mrf.mxu3 }
 0x146   :  { %2243 = vmatmul.f32.vlgmr.msrb.gmra.mxu1 %v2207_v15 }
 0x147   :  { %v523_v58 = vadd.f32 %v522_v20, %v482_v12 }
 0x148   :  { %2321 = vmatmul.f32.vlgmr.msra.gmra.mxu0 %v2207_v15  ;;  %v1018_v55 = vpop.f32.mrf.mxu2 }
 0x149   :  { %v677_v2 = vpop.f32.mrf.mxu0  ;;  %v624_v23 = vadd.f32 %v623_v44, %v523_v58 }
 0x14b   :  { %v716_v45 = vpop.f32.mrf.mxu1  ;;  %v678_v39 = vadd.f32 %v677_v2, %v624_v23 }
 0x14d   :  { %v717_v16 = vadd.f32 %v716_v45, %v678_v39  ;;  %v822_v31 = vpop.f32.mrf.mxu3 }
 0x14e   :  { %2344 = vmatmul.f32.vlgmr.msra.gmra.mxu1 %v2207_v15 }
 0x14f   :  { %v786_v22 = vadd.f32 %v785_v6, %v717_v16 }
 0x150   :  { %v1204_v43 = vpop.f32.mrf.mxu2 }
 0x151   :  { %v863_v3 = vpop.f32.mrf.mxu0  ;;  %v823_v46 = vadd.f32 %v822_v31, %v786_v22 }
 0x153   :  { %v964_v28 = vpop.f32.mrf.mxu1  ;;  %v864_v0 = vadd.f32 %v863_v3, %v823_v46 }
 0x155   :  { %v965_v41 = vadd.f32 %v964_v28, %v864_v0  ;;  %v1057_v17 = vpop.f32.mrf.mxu3 }
 0x157   :  { %v1019_v53 = vadd.f32 %v1018_v55, %v965_v41 }
 0x158   :  { %v1467_v57 = vpop.f32.mrf.mxu2 }
 0x159   :  { %v1126_v14 = vpop.f32.mrf.mxu0  ;;  %v1058_v51 = vadd.f32 %v1057_v17, %v1019_v53 }
 0x15b   :  { %v1163_v34 = vpop.f32.mrf.mxu1  ;;  %v1127_v10 = vadd.f32 %v1126_v14, %v1058_v51 }
 0x15d   :  { %v1164_v63 = vadd.f32 %v1163_v34, %v1127_v10  ;;  %v1305_v19 = vpop.f32.mrf.mxu3 }
 0x15f   :  { %v1205_v5 = vadd.f32 %v1204_v43, %v1164_v63 }
 0x161   :  { %v1359_v59 = vpop.f32.mrf.mxu0  ;;  %v1306_v1 = vadd.f32 %v1305_v19, %v1205_v5 }
 0x163   :  { %v1398_v61 = vpop.f32.mrf.mxu1  ;;  %v1360_v56 = vadd.f32 %v1359_v59, %v1306_v1 }
 0x165   :  { %v1399_v49 = vadd.f32 %v1398_v61, %v1360_v56  ;;  %v1504_v18 = vpop.f32.mrf.mxu3 }
 0x167   :  { %v1468_v29 = vadd.f32 %v1467_v57, %v1399_v49 }
 0x169   :  { %v1505_v15 = vadd.f32 %v1504_v18, %v1468_v29 }
 0x16f   :  { %v1545_v36 = vpop.f32.mrf.mxu0 }
 0x170   :  { %v1546_v60 = vadd.f32 %v1545_v36, %v1505_v15 }
 0x179   :  { %v1646_v13 = vpop.f32.mrf.mxu1  ;;  %v1700_v26 = vpop.f32.mrf.mxu2 }
 0x17a   :  { %v1647_v35 = vadd.f32 %v1646_v13, %v1546_v60 }
 0x17c   :  { %v1701_v27 = vadd.f32 %v1700_v26, %v1647_v35  ;;  %v1739_v8 = vpop.f32.mrf.mxu3 }
 0x17e   :  { %v1740_v40 = vadd.f32 %v1739_v8, %v1701_v27 }
 0x191   :  { %v1808_v47 = vpop.f32.mrf.mxu0 }
 0x192   :  { %v1809_v25 = vadd.f32 %v1808_v47, %v1740_v40 }
 0x19b   :  { %v1845_v38 = vpop.f32.mrf.mxu1  ;;  %v1886_v37 = vpop.f32.mrf.mxu2 }
 0x19c   :  { %v1846_v24 = vadd.f32 %v1845_v38, %v1809_v25 }
 0x19e   :  { %v1887_v30 = vadd.f32 %v1886_v37, %v1846_v24  ;;  %v1987_v11 = vpop.f32.mrf.mxu3 }
 0x1a0   :  { %v1988_v50 = vadd.f32 %v1987_v11, %v1887_v30 }
 0x1b3   :  { %v2041_v62 = vpop.f32.mrf.mxu0 }
 0x1b4   :  { %v2042_v33 = vadd.f32 %v2041_v62, %v1988_v50 }
 0x1bb   :  { %v2080_v32 = vpop.f32.mrf.mxu1 }
 0x1bc   :  { %v2081_v42 = vadd.f32 %v2080_v32, %v2042_v33 }
 0x1bd   :  { %v2149_v9 = vpop.f32.mrf.mxu2  ;;  %v2213_v48 = vpop.f32.mrf.mxu0 }
 0x1be   :  { %v2150_v52 = vadd.f32 %v2149_v9, %v2081_v42 }
 0x1c0   :  { %v2186_v54 = vpop.f32.mrf.mxu3 }
 0x1c1   :  { %v2187_v4 = vadd.f32 %v2186_v54, %v2150_v52 }
 0x1c3   :  { %v2214_v21 = vadd.f32 %v2213_v48, %v2187_v4  ;;  %v2244_v7 = vpop.f32.mrf.mxu1 }
 0x1c5   :  { %v2245_v12 = vadd.f32 %v2244_v7, %v2214_v21  ;;  %v2270_v20 = vpop.f32.mrf.mxu2  ;;  %v2322_v2 = vpop.f32.mrf.mxu0 }
 0x1c7   :  { %v2271_v58 = vadd.f32 %v2270_v20, %v2245_v12 }
 0x1c8   :  { %v2295_v44 = vpop.f32.mrf.mxu3 }
 0x1c9   :  { %v2296_v23 = vadd.f32 %v2295_v44, %v2271_v58 }
 0x1cb   :  { %v2323_v45 = vadd.f32 %v2322_v2, %v2296_v23  ;;  %v2345_v39 = vpop.f32.mrf.mxu1 }
 0x1cd   :  { %v2346_v16 = vadd.f32 %v2345_v39, %v2323_v45 }
 0x1cf   :  { %2348 = vmax.xlane.f32.xlu0 %v2346_v16 }
 0x242   :  { %v2349_v6 = vpop.xlane.xlu0 %2348 }
 0x243   :  { %v2350_v22 = vsub.f32 %v2346_v16, %v2349_v6 }
 0x245   :  { %v2351_v31 = vmul.f32 1.442695, %v2350_v22 }
 0x247   :  { %2368 = vpow2.f32 %v2351_v31 }
 0x24d   :  { %v2369_v3 = vpop.eup %2368 }
 0x24e   :  { %2353 = vadd.xlane.f32.xlu0 %v2369_v3 }
 0x2c1   :  { %v2354_v46 = vpop.xlane.xlu0 %2353 }
 0x2c2   :  { %2370 = vlog2.f32 %v2354_v46 }
 0x2c8   :  { %v2371_v28 = vpop.eup %2370 }
 0x2c9   :  { %v2356_v0 = vmul.f32 0.6931472, %v2371_v28 }
 0x2cb   :  { %v2357_v41 = vsub.f32 %v2350_v22, %v2356_v0 }
 0x2cd   :  { %2358 = vst [vmem:[%s3980_s3] sm:$0xff] %v2357_v41 }
 0x2ce   :  { %2363 = vsyncpa [#allocation3], 1 }

</bundles_post_ra>
